<compile_context>
chip_gen: v6e
topology: v6e:2x2x1
jax: 0.10.0
libtpu: 0.0.40
codegen_flags: <defaults>
</compile_context>

<pallas_src>
import numpy as np
import jax
import jax.numpy as jnp
from jax.experimental import pallas as pl
from jax.experimental.pallas import tpu as pltpu


# ---------------------------------------------------------------------------
# One-time host-side weight packing (numpy; runs once, outside jit)
# ---------------------------------------------------------------------------
def pack_params(p, tb):
    """Repack PyTorch-layout LeNet params into batched matmul constants.

    tb = number of images processed per grid step (pooling matrices are
    block-diagonal over the tb images, so they depend on tb).
    """
    w1 = np.asarray(p["w1"], np.float32)   # (6, 1, 5, 5)
    b1 = np.asarray(p["b1"], np.float32)   # (6,)
    w2 = np.asarray(p["w2"], np.float32)   # (16, 6, 5, 5)
    b2 = np.asarray(p["b2"], np.float32)   # (16,)
    w3 = np.asarray(p["w3"], np.float32)   # (120, 400)
    b3 = np.asarray(p["b3"], np.float32)   # (120,)
    w4 = np.asarray(p["w4"], np.float32)   # (84, 120)
    b4 = np.asarray(p["b4"], np.float32)   # (84,)
    w5 = np.asarray(p["w5"], np.float32)   # (10, 84)
    b5 = np.asarray(p["b5"], np.float32)   # (10,)

    # conv1: per-kernel-row Toeplitz (28 in-lanes -> 28*6 out-lanes) with the
    # W zero-padding (pad=2) folded in.  Activation lanes are w*Cin (+ci).
    m1 = np.zeros((5, 28, 28 * 6), np.float32)
    for i in range(5):
        for j in range(5):
            for wo in range(28):
                wi = wo + j - 2
                if 0 <= wi < 28:
                    m1[i, wi, wo * 6:(wo + 1) * 6] += w1[:, 0, i, j]

    # conv2: per-kernel-row Toeplitz acting directly on the *un-lane-pooled*
    # conv1 output (168 lanes = 28 W positions x 6 ch); the 2x2 pool's W
    # average (factor 0.5) is folded into the weights here.
    m2 = np.zeros((5, 28 * 6, 10 * 16), np.float32)
    for i in range(5):
        for wl in range(28):
            for wo in range(10):
                j = wl // 2 - wo
                if 0 <= j < 5:
                    # (ci, co) block
                    m2[i, wl * 6:(wl + 1) * 6, wo * 16:(wo + 1) * 16] += \
                        0.5 * w2[:, :, i, j].T

    # fc1: per-pooled-row (h) weight blocks acting on the un-lane-pooled conv2
    # output (160 lanes = 10 W x 16 ch); pool-2's W average folded in, and the
    # PyTorch flatten order (c*25 + h*5 + w) re-indexed accordingly.
    # N padded 120 -> 128 lanes.
    w3f = np.zeros((5, 10 * 16, 128), np.float32)
    for h in range(5):
        for wl in range(10):
            for c in range(16):
                w3f[h, wl * 16 + c, :120] = 0.5 * w3[:, c * 25 + h * 5 + wl // 2]

    # Row-pooling matrices (block diagonal over the tb images).  They also
    # drop the 4 cross-image "garbage" rows produced by the full-block convs.
    ph1 = np.zeros((tb * 14, tb * 32 - 4), np.float32)     # -> 14 rows/image, b-major
    for b in range(tb):
        for hp in range(14):
            ph1[b * 14 + hp, b * 32 + 2 * hp] = 0.5
            ph1[b * 14 + hp, b * 32 + 2 * hp + 1] = 0.5
    ph2 = np.zeros((tb * 5, tb * 14 - 4), np.float32)      # -> rows h*tb + b (h-major)
    for b in range(tb):
        for h in range(5):
            ph2[h * tb + b, b * 14 + 2 * h] = 0.5
            ph2[h * tb + b, b * 14 + 2 * h + 1] = 0.5

    # fc2 / fc3 padded to 128 lanes (zero columns / rows) for dense vregs and
    # a dense (TB, 128) output store.
    w4p = np.zeros((128, 128), np.float32); w4p[:120, :84] = w4.T
    w5p = np.zeros((128, 128), np.float32); w5p[:84, :10] = w5.T
    b3p = np.zeros((1, 128), np.float32); b3p[0, :120] = b3
    b4p = np.zeros((1, 128), np.float32); b4p[0, :84] = b4
    b5p = np.zeros((1, 128), np.float32); b5p[0, :10] = b5

    bf16, f32 = jnp.bfloat16, jnp.float32
    return {
        "m1":  jnp.asarray(m1, bf16),                               # (5, 28, 168)
        "b1":  jnp.asarray(np.tile(b1, 28)[None, :], f32),          # (1, 168)
        "ph1": jnp.asarray(ph1, bf16),                              # (tb*14, tb*32-4)
        "m2":  jnp.asarray(m2, bf16),                               # (5, 168, 160)
        "b2":  jnp.asarray(np.tile(b2, 10)[None, :], f32),          # (1, 160)
        "ph2": jnp.asarray(ph2, bf16),                              # (tb*5, tb*14-4)
        "w3":  jnp.asarray(w3f, bf16),                              # (5, 160, 128)
        "b3":  jnp.asarray(b3p, f32),                               # (1, 128)
        "w4":  jnp.asarray(w4p, bf16),                              # (128, 128)
        "b4":  jnp.asarray(b4p, f32),                               # (1, 128)
        "w5":  jnp.asarray(w5p, bf16),                              # (128, 128)
        "b5":  jnp.asarray(b5p, f32),                               # (1, 128)
    }


# ---------------------------------------------------------------------------
# The single fused Pallas kernel: one grid step == TB batch elements
# ---------------------------------------------------------------------------
def _lenet_kernel(x_ref, m1_ref, b1_ref, ph1_ref, m2_ref, b2_ref, ph2_ref,
                  w3_ref, b3_ref, w4_ref, b4_ref, w5_ref, b5_ref, out_ref):
    f32, bf16 = jnp.float32, jnp.bfloat16

    def dot(a, b):
        return jnp.dot(a, b, preferred_element_type=f32)

    tb = out_ref.shape[1]                          # images per grid step

    # ---- conv1 (5x5, pad=2) + bias + ReLU ----------------------------------
    # TB images stacked along sublanes, 32 H-padded rows each.  Kernel row i
    # contributes X[r+i, :] @ m1[i] to output row r; the few rows straddling an
    # image boundary are garbage and are dropped by ph1 below.
    xb = x_ref[...]                                # (TB*32, 28) f32
    n1 = xb.shape[0] - 4
    acc1 = dot(xb[0:n1, :].astype(bf16), m1_ref[0])
    for i in range(1, 5):
        acc1 = acc1 + dot(xb[i:i + n1, :].astype(bf16), m1_ref[i])
    y1 = jnp.maximum(acc1 + b1_ref[...], 0.0)      # (TB*32-4, 168) f32

    # ---- pool1: H average via block-diag matmul (also drops garbage rows,
    # repacks to 14 rows/image); W average is folded into m2. ----------------
    p1 = dot(ph1_ref[...], y1.astype(bf16))        # (TB*14, 168) f32

    # ---- conv2 (5x5, valid) + bias + ReLU ----------------------------------
    n2 = p1.shape[0] - 4
    acc2 = dot(p1[0:n2, :].astype(bf16), m2_ref[0])
    for i in range(1, 5):
        acc2 = acc2 + dot(p1[i:i + n2, :].astype(bf16), m2_ref[i])
    y2 = jnp.maximum(acc2 + b2_ref[...], 0.0)      # (TB*14-4, 160) f32

    # ---- pool2: H average -> rows ordered h*TB + b; W average folded in w3 -
    p2 = dot(ph2_ref[...], y2.astype(bf16))        # (TB*5, 160) f32

    # ---- flatten + fc1 + ReLU (flatten folded into per-h weight blocks) ----
    acc3 = dot(p2[0:tb, :].astype(bf16), w3_ref[0])
    for h in range(1, 5):
        acc3 = acc3 + dot(p2[h * tb:(h + 1) * tb, :].astype(bf16), w3_ref[h])
    f1 = jnp.maximum(acc3 + b3_ref[...], 0.0)      # (TB, 128) f32

    # ---- fc2 + ReLU, fc3 (padded to 128 lanes for a dense store) -----------
    f2 = jnp.maximum(dot(f1.astype(bf16), w4_ref[...]) + b4_ref[...], 0.0)
    logits = dot(f2.astype(bf16), w5_ref[...]) + b5_ref[...]   # (TB, 128)
    out_ref[...] = logits.reshape(out_ref.shape)


def lenet_forward(packed, x):
    """x: (B, 1, 28, 28) f32 -> (B, 10) f32 logits.  One fused Pallas kernel."""
    assert x.shape[1:] == (1, 28, 28), x.shape
    B = x.shape[0]
    tb = packed["ph1"].shape[0] // 14              # images per grid step (static)
    nb = -(-B // tb)                               # number of grid steps
    Bp = nb * tb

    # Pad batch to a multiple of tb and H to 32 (W padding is folded into m1),
    # then stack images along sublanes.
    xh = jnp.pad(x[:, 0], ((0, Bp - B), (2, 2), (0, 0)))     # (Bp, 32, 28)
    xr = xh.reshape(Bp * 32, 28)

    order = ("m1", "b1", "ph1", "m2", "b2", "ph2",
             "w3", "b3", "w4", "b4", "w5", "b5")
    consts = [packed[k] for k in order]

    def whole(a):           # full-array block, VMEM-resident across grid steps
        zeros = (0,) * a.ndim
        return pl.BlockSpec(a.shape, lambda b, zeros=zeros: zeros)

    weight_bytes = sum(int(c.size) * c.dtype.itemsize for c in consts)
    cost = pl.CostEstimate(
        flops=4_400_000 * Bp,
        transcendentals=0,
        bytes_accessed=int(xr.size) * 4 + Bp * 128 * 4 + weight_bytes,
    )

    out = pl.pallas_call(
        _lenet_kernel,
        out_shape=jax.ShapeDtypeStruct((nb, tb, 128), jnp.float32),
        grid=(nb,),
        in_specs=[pl.BlockSpec((tb * 32, 28), lambda b: (b, 0))]
                 + [whole(c) for c in consts],
        out_specs=pl.BlockSpec((1, tb, 128), lambda b: (b, 0, 0)),
        compiler_params=pltpu.CompilerParams(
            dimension_semantics=("parallel",)),
        cost_estimate=cost,
    )(xr, *consts)
    return out.reshape(Bp, 128)[:B, :10]


# ---------------------------------------------------------------------------
# LeNet parameters (deterministic, PyTorch-style uniform fan-in init)
# ---------------------------------------------------------------------------
def init_params(key):
    ks = jax.random.split(key, 10)

    def u(k, shape, fan_in):
        bound = 1.0 / jnp.sqrt(jnp.float32(fan_in))
        return jax.random.uniform(k, shape, jnp.float32, -bound, bound)

    return {
        "w1": u(ks[0], (6, 1, 5, 5), 25),    "b1": u(ks[1], (6,), 25),
        "w2": u(ks[2], (16, 6, 5, 5), 150),  "b2": u(ks[3], (16,), 150),
        "w3": u(ks[4], (120, 400), 400),     "b3": u(ks[5], (120,), 400),
        "w4": u(ks[6], (84, 120), 120),      "b4": u(ks[7], (84,), 120),
        "w5": u(ks[8], (10, 84), 84),        "b5": u(ks[9], (10,), 84),
    }


# ---------------------------------------------------------------------------
# Pure-JAX reference (correctness check only)
# ---------------------------------------------------------------------------
def lenet_reference(p, x):
    def conv(y, w, b, pad):
        dn = jax.lax.conv_dimension_numbers(y.shape, w.shape, ("NCHW", "OIHW", "NCHW"))
        y = jax.lax.conv_general_dilated(y, w, (1, 1), [(pad, pad), (pad, pad)],
                                         dimension_numbers=dn)
        return jax.nn.relu(y + b[None, :, None, None])

    def pool(y):
        return jax.lax.reduce_window(y, 0.0, jax.lax.add,
                                     (1, 1, 2, 2), (1, 1, 2, 2), "VALID") / 4.0

    y = pool(conv(x, p["w1"], p["b1"], 2))
    y = pool(conv(y, p["w2"], p["b2"], 0))
    y = y.reshape(y.shape[0], -1)
    y = jax.nn.relu(y @ p["w3"].T + p["b3"])
    y = jax.nn.relu(y @ p["w4"].T + p["b4"])
    return y @ p["w5"].T + p["b5"]


if __name__ == "__main__":
    key = jax.random.PRNGKey(0)
    pkey, xkey = jax.random.split(key)
    params = init_params(pkey)

    B, TB = 4, 2          # 2 images per grid step, 2 grid steps (v7x-friendly)
    x = jax.random.normal(xkey, (B, 1, 28, 28), jnp.float32)

    packed = pack_params(params, TB)      # one-time host-side weight repacking
    fwd = jax.jit(lenet_forward)
    out = jax.block_until_ready(fwd(packed, x))
    assert out.shape == (B, 10), out.shape

    ref = lenet_reference(params, x)
    err = float(jnp.max(jnp.abs(out - ref)))
    # bf16 MXU inputs with f32 accumulation: a few 1e-3 absolute error expected.
    assert err < 2e-2, f"mismatch vs JAX reference: max abs err = {err}"

    print("KERNEL_OK")
</pallas_src>

<mosaic_0001>
module attributes {stable_mosaic.version = 11 : i64} {
  func.func @_lenet_kernel(%arg0: i32, %arg1: memref<64x28xf32, #tpu.memory_space<vmem>>, %arg2: memref<5x28x168xbf16, #tpu.memory_space<vmem>>, %arg3: memref<1x168xf32, #tpu.memory_space<vmem>>, %arg4: memref<28x60xbf16, #tpu.memory_space<vmem>>, %arg5: memref<5x168x160xbf16, #tpu.memory_space<vmem>>, %arg6: memref<1x160xf32, #tpu.memory_space<vmem>>, %arg7: memref<10x24xbf16, #tpu.memory_space<vmem>>, %arg8: memref<5x160x128xbf16, #tpu.memory_space<vmem>>, %arg9: memref<1x128xf32, #tpu.memory_space<vmem>>, %arg10: memref<128x128xbf16, #tpu.memory_space<vmem>>, %arg11: memref<1x128xf32, #tpu.memory_space<vmem>>, %arg12: memref<128x128xbf16, #tpu.memory_space<vmem>>, %arg13: memref<1x128xf32, #tpu.memory_space<vmem>>, %arg14: memref<1x2x128xf32, #tpu.memory_space<vmem>>) attributes {dimension_semantics = [#tpu.dimension_semantics<parallel>], iteration_bounds = array<i64: 2>, scalar_prefetch = 0 : i64, scratch_operands = 0 : i64, tpu.core_type = #tpu.core_type<tc>, window_params = [{transform_indices = @transform_0, window_bounds = array<i64: 64, 28>}, {pipeline_mode = #tpu.pipeline_mode<synchronous>, transform_indices = @transform_1, window_bounds = array<i64: 5, 28, 168>}, {pipeline_mode = #tpu.pipeline_mode<synchronous>, transform_indices = @transform_2, window_bounds = array<i64: 1, 168>}, {pipeline_mode = #tpu.pipeline_mode<synchronous>, transform_indices = @transform_3, window_bounds = array<i64: 28, 60>}, {pipeline_mode = #tpu.pipeline_mode<synchronous>, transform_indices = @transform_4, window_bounds = array<i64: 5, 168, 160>}, {pipeline_mode = #tpu.pipeline_mode<synchronous>, transform_indices = @transform_5, window_bounds = array<i64: 1, 160>}, {pipeline_mode = #tpu.pipeline_mode<synchronous>, transform_indices = @transform_6, window_bounds = array<i64: 10, 24>}, {pipeline_mode = #tpu.pipeline_mode<synchronous>, transform_indices = @transform_7, window_bounds = array<i64: 5, 160, 128>}, {pipeline_mode = #tpu.pipeline_mode<synchronous>, transform_indices = @transform_8, window_bounds = array<i64: 1, 128>}, {pipeline_mode = #tpu.pipeline_mode<synchronous>, transform_indices = @transform_9, window_bounds = array<i64: 128, 128>}, {pipeline_mode = #tpu.pipeline_mode<synchronous>, transform_indices = @transform_10, window_bounds = array<i64: 1, 128>}, {pipeline_mode = #tpu.pipeline_mode<synchronous>, transform_indices = @transform_11, window_bounds = array<i64: 128, 128>}, {pipeline_mode = #tpu.pipeline_mode<synchronous>, transform_indices = @transform_12, window_bounds = array<i64: 1, 128>}, {transform_indices = @transform_13, window_bounds = array<i64: 1, 2, 128>}]} {
    %c0 = arith.constant 0 : index
    %c0_0 = arith.constant 0 : index
    %0 = vector.load %arg1[%c0, %c0_0] : memref<64x28xf32, #tpu.memory_space<vmem>>, vector<64x28xf32>
    %1 = vector.extract_strided_slice %0 {offsets = [0, 0], sizes = [60, 28], strides = [1, 1]} : vector<64x28xf32> to vector<60x28xf32>
    %2 = arith.truncf %1 : vector<60x28xf32> to vector<60x28xbf16>
    %c0_1 = arith.constant 0 : index
    %c0_2 = arith.constant 0 : index
    %c0_3 = arith.constant 0 : index
    %3 = vector.load %arg2[%c0_1, %c0_2, %c0_3] : memref<5x28x168xbf16, #tpu.memory_space<vmem>>, vector<1x28x168xbf16>
    %4 = vector.shape_cast %3 : vector<1x28x168xbf16> to vector<28x168xbf16>
    %cst = arith.constant dense<0.000000e+00> : vector<60x168xf32>
    %5 = tpu.matmul %2, %4, %cst {dimension_numbers = #tpu.dot_dimension_numbers<[1], [0], [0], [1], [0, 0, 1, 1], [], []>} : vector<60x28xbf16>, vector<28x168xbf16>, vector<60x168xf32> -> vector<60x168xf32>
    %6 = vector.extract_strided_slice %0 {offsets = [1, 0], sizes = [60, 28], strides = [1, 1]} : vector<64x28xf32> to vector<60x28xf32>
    %7 = arith.truncf %6 : vector<60x28xf32> to vector<60x28xbf16>
    %c1 = arith.constant 1 : index
    %c0_4 = arith.constant 0 : index
    %c0_5 = arith.constant 0 : index
    %8 = vector.load %arg2[%c1, %c0_4, %c0_5] : memref<5x28x168xbf16, #tpu.memory_space<vmem>>, vector<1x28x168xbf16>
    %9 = vector.shape_cast %8 : vector<1x28x168xbf16> to vector<28x168xbf16>
    %cst_6 = arith.constant dense<0.000000e+00> : vector<60x168xf32>
    %10 = tpu.matmul %7, %9, %cst_6 {dimension_numbers = #tpu.dot_dimension_numbers<[1], [0], [0], [1], [0, 0, 1, 1], [], []>} : vector<60x28xbf16>, vector<28x168xbf16>, vector<60x168xf32> -> vector<60x168xf32>
    %11 = arith.addf %5, %10 : vector<60x168xf32>
    %12 = vector.extract_strided_slice %0 {offsets = [2, 0], sizes = [60, 28], strides = [1, 1]} : vector<64x28xf32> to vector<60x28xf32>
    %13 = arith.truncf %12 : vector<60x28xf32> to vector<60x28xbf16>
    %c2 = arith.constant 2 : index
    %c0_7 = arith.constant 0 : index
    %c0_8 = arith.constant 0 : index
    %14 = vector.load %arg2[%c2, %c0_7, %c0_8] : memref<5x28x168xbf16, #tpu.memory_space<vmem>>, vector<1x28x168xbf16>
    %15 = vector.shape_cast %14 : vector<1x28x168xbf16> to vector<28x168xbf16>
    %cst_9 = arith.constant dense<0.000000e+00> : vector<60x168xf32>
    %16 = tpu.matmul %13, %15, %cst_9 {dimension_numbers = #tpu.dot_dimension_numbers<[1], [0], [0], [1], [0, 0, 1, 1], [], []>} : vector<60x28xbf16>, vector<28x168xbf16>, vector<60x168xf32> -> vector<60x168xf32>
    %17 = arith.addf %11, %16 : vector<60x168xf32>
    %18 = vector.extract_strided_slice %0 {offsets = [3, 0], sizes = [60, 28], strides = [1, 1]} : vector<64x28xf32> to vector<60x28xf32>
    %19 = arith.truncf %18 : vector<60x28xf32> to vector<60x28xbf16>
    %c3 = arith.constant 3 : index
    %c0_10 = arith.constant 0 : index
    %c0_11 = arith.constant 0 : index
    %20 = vector.load %arg2[%c3, %c0_10, %c0_11] : memref<5x28x168xbf16, #tpu.memory_space<vmem>>, vector<1x28x168xbf16>
    %21 = vector.shape_cast %20 : vector<1x28x168xbf16> to vector<28x168xbf16>
    %cst_12 = arith.constant dense<0.000000e+00> : vector<60x168xf32>
    %22 = tpu.matmul %19, %21, %cst_12 {dimension_numbers = #tpu.dot_dimension_numbers<[1], [0], [0], [1], [0, 0, 1, 1], [], []>} : vector<60x28xbf16>, vector<28x168xbf16>, vector<60x168xf32> -> vector<60x168xf32>
    %23 = arith.addf %17, %22 : vector<60x168xf32>
    %24 = vector.extract_strided_slice %0 {offsets = [4, 0], sizes = [60, 28], strides = [1, 1]} : vector<64x28xf32> to vector<60x28xf32>
    %25 = arith.truncf %24 : vector<60x28xf32> to vector<60x28xbf16>
    %c4 = arith.constant 4 : index
    %c0_13 = arith.constant 0 : index
    %c0_14 = arith.constant 0 : index
    %26 = vector.load %arg2[%c4, %c0_13, %c0_14] : memref<5x28x168xbf16, #tpu.memory_space<vmem>>, vector<1x28x168xbf16>
    %27 = vector.shape_cast %26 : vector<1x28x168xbf16> to vector<28x168xbf16>
    %cst_15 = arith.constant dense<0.000000e+00> : vector<60x168xf32>
    %28 = tpu.matmul %25, %27, %cst_15 {dimension_numbers = #tpu.dot_dimension_numbers<[1], [0], [0], [1], [0, 0, 1, 1], [], []>} : vector<60x28xbf16>, vector<28x168xbf16>, vector<60x168xf32> -> vector<60x168xf32>
    %29 = arith.addf %23, %28 : vector<60x168xf32>
    %c0_16 = arith.constant 0 : index
    %c0_17 = arith.constant 0 : index
    %30 = vector.load %arg3[%c0_16, %c0_17] : memref<1x168xf32, #tpu.memory_space<vmem>>, vector<1x168xf32>
    %31 = vector.broadcast %30 : vector<1x168xf32> to vector<60x168xf32>
    %32 = arith.addf %29, %31 : vector<60x168xf32>
    %cst_18 = arith.constant 0.000000e+00 : f32
    %33 = vector.broadcast %cst_18 : f32 to vector<60x168xf32>
    %34 = arith.maximumf %32, %33 : vector<60x168xf32>
    %c0_19 = arith.constant 0 : index
    %c0_20 = arith.constant 0 : index
    %35 = vector.load %arg4[%c0_19, %c0_20] : memref<28x60xbf16, #tpu.memory_space<vmem>>, vector<28x60xbf16>
    %36 = arith.truncf %34 : vector<60x168xf32> to vector<60x168xbf16>
    %cst_21 = arith.constant dense<0.000000e+00> : vector<28x168xf32>
    %37 = tpu.matmul %35, %36, %cst_21 {dimension_numbers = #tpu.dot_dimension_numbers<[1], [0], [0], [1], [0, 0, 1, 1], [], []>} : vector<28x60xbf16>, vector<60x168xbf16>, vector<28x168xf32> -> vector<28x168xf32>
    %38 = vector.extract_strided_slice %37 {offsets = [0, 0], sizes = [24, 168], strides = [1, 1]} : vector<28x168xf32> to vector<24x168xf32>
    %39 = arith.truncf %38 : vector<24x168xf32> to vector<24x168xbf16>
    %c0_22 = arith.constant 0 : index
    %c0_23 = arith.constant 0 : index
    %c0_24 = arith.constant 0 : index
    %40 = vector.load %arg5[%c0_22, %c0_23, %c0_24] : memref<5x168x160xbf16, #tpu.memory_space<vmem>>, vector<1x168x160xbf16>
    %41 = vector.shape_cast %40 : vector<1x168x160xbf16> to vector<168x160xbf16>
    %cst_25 = arith.constant dense<0.000000e+00> : vector<24x160xf32>
    %42 = tpu.matmul %39, %41, %cst_25 {dimension_numbers = #tpu.dot_dimension_numbers<[1], [0], [0], [1], [0, 0, 1, 1], [], []>} : vector<24x168xbf16>, vector<168x160xbf16>, vector<24x160xf32> -> vector<24x160xf32>
    %43 = vector.extract_strided_slice %37 {offsets = [1, 0], sizes = [24, 168], strides = [1, 1]} : vector<28x168xf32> to vector<24x168xf32>
    %44 = arith.truncf %43 : vector<24x168xf32> to vector<24x168xbf16>
    %c1_26 = arith.constant 1 : index
    %c0_27 = arith.constant 0 : index
    %c0_28 = arith.constant 0 : index
    %45 = vector.load %arg5[%c1_26, %c0_27, %c0_28] : memref<5x168x160xbf16, #tpu.memory_space<vmem>>, vector<1x168x160xbf16>
    %46 = vector.shape_cast %45 : vector<1x168x160xbf16> to vector<168x160xbf16>
    %cst_29 = arith.constant dense<0.000000e+00> : vector<24x160xf32>
    %47 = tpu.matmul %44, %46, %cst_29 {dimension_numbers = #tpu.dot_dimension_numbers<[1], [0], [0], [1], [0, 0, 1, 1], [], []>} : vector<24x168xbf16>, vector<168x160xbf16>, vector<24x160xf32> -> vector<24x160xf32>
    %48 = arith.addf %42, %47 : vector<24x160xf32>
    %49 = vector.extract_strided_slice %37 {offsets = [2, 0], sizes = [24, 168], strides = [1, 1]} : vector<28x168xf32> to vector<24x168xf32>
    %50 = arith.truncf %49 : vector<24x168xf32> to vector<24x168xbf16>
    %c2_30 = arith.constant 2 : index
    %c0_31 = arith.constant 0 : index
    %c0_32 = arith.constant 0 : index
    %51 = vector.load %arg5[%c2_30, %c0_31, %c0_32] : memref<5x168x160xbf16, #tpu.memory_space<vmem>>, vector<1x168x160xbf16>
    %52 = vector.shape_cast %51 : vector<1x168x160xbf16> to vector<168x160xbf16>
    %cst_33 = arith.constant dense<0.000000e+00> : vector<24x160xf32>
    %53 = tpu.matmul %50, %52, %cst_33 {dimension_numbers = #tpu.dot_dimension_numbers<[1], [0], [0], [1], [0, 0, 1, 1], [], []>} : vector<24x168xbf16>, vector<168x160xbf16>, vector<24x160xf32> -> vector<24x160xf32>
    %54 = arith.addf %48, %53 : vector<24x160xf32>
    %55 = vector.extract_strided_slice %37 {offsets = [3, 0], sizes = [24, 168], strides = [1, 1]} : vector<28x168xf32> to vector<24x168xf32>
    %56 = arith.truncf %55 : vector<24x168xf32> to vector<24x168xbf16>
    %c3_34 = arith.constant 3 : index
    %c0_35 = arith.constant 0 : index
    %c0_36 = arith.constant 0 : index
    %57 = vector.load %arg5[%c3_34, %c0_35, %c0_36] : memref<5x168x160xbf16, #tpu.memory_space<vmem>>, vector<1x168x160xbf16>
    %58 = vector.shape_cast %57 : vector<1x168x160xbf16> to vector<168x160xbf16>
    %cst_37 = arith.constant dense<0.000000e+00> : vector<24x160xf32>
    %59 = tpu.matmul %56, %58, %cst_37 {dimension_numbers = #tpu.dot_dimension_numbers<[1], [0], [0], [1], [0, 0, 1, 1], [], []>} : vector<24x168xbf16>, vector<168x160xbf16>, vector<24x160xf32> -> vector<24x160xf32>
    %60 = arith.addf %54, %59 : vector<24x160xf32>
    %61 = vector.extract_strided_slice %37 {offsets = [4, 0], sizes = [24, 168], strides = [1, 1]} : vector<28x168xf32> to vector<24x168xf32>
    %62 = arith.truncf %61 : vector<24x168xf32> to vector<24x168xbf16>
    %c4_38 = arith.constant 4 : index
    %c0_39 = arith.constant 0 : index
    %c0_40 = arith.constant 0 : index
    %63 = vector.load %arg5[%c4_38, %c0_39, %c0_40] : memref<5x168x160xbf16, #tpu.memory_space<vmem>>, vector<1x168x160xbf16>
    %64 = vector.shape_cast %63 : vector<1x168x160xbf16> to vector<168x160xbf16>
    %cst_41 = arith.constant dense<0.000000e+00> : vector<24x160xf32>
    %65 = tpu.matmul %62, %64, %cst_41 {dimension_numbers = #tpu.dot_dimension_numbers<[1], [0], [0], [1], [0, 0, 1, 1], [], []>} : vector<24x168xbf16>, vector<168x160xbf16>, vector<24x160xf32> -> vector<24x160xf32>
    %66 = arith.addf %60, %65 : vector<24x160xf32>
    %c0_42 = arith.constant 0 : index
    %c0_43 = arith.constant 0 : index
    %67 = vector.load %arg6[%c0_42, %c0_43] : memref<1x160xf32, #tpu.memory_space<vmem>>, vector<1x160xf32>
    %68 = vector.broadcast %67 : vector<1x160xf32> to vector<24x160xf32>
    %69 = arith.addf %66, %68 : vector<24x160xf32>
    %cst_44 = arith.constant 0.000000e+00 : f32
    %70 = vector.broadcast %cst_44 : f32 to vector<24x160xf32>
    %71 = arith.maximumf %69, %70 : vector<24x160xf32>
    %c0_45 = arith.constant 0 : index
    %c0_46 = arith.constant 0 : index
    %72 = vector.load %arg7[%c0_45, %c0_46] : memref<10x24xbf16, #tpu.memory_space<vmem>>, vector<10x24xbf16>
    %73 = arith.truncf %71 : vector<24x160xf32> to vector<24x160xbf16>
    %cst_47 = arith.constant dense<0.000000e+00> : vector<10x160xf32>
    %74 = tpu.matmul %72, %73, %cst_47 {dimension_numbers = #tpu.dot_dimension_numbers<[1], [0], [0], [1], [0, 0, 1, 1], [], []>} : vector<10x24xbf16>, vector<24x160xbf16>, vector<10x160xf32> -> vector<10x160xf32>
    %75 = vector.extract_strided_slice %74 {offsets = [0, 0], sizes = [2, 160], strides = [1, 1]} : vector<10x160xf32> to vector<2x160xf32>
    %76 = arith.truncf %75 : vector<2x160xf32> to vector<2x160xbf16>
    %c0_48 = arith.constant 0 : index
    %c0_49 = arith.constant 0 : index
    %c0_50 = arith.constant 0 : index
    %77 = vector.load %arg8[%c0_48, %c0_49, %c0_50] : memref<5x160x128xbf16, #tpu.memory_space<vmem>>, vector<1x160x128xbf16>
    %78 = vector.shape_cast %77 : vector<1x160x128xbf16> to vector<160x128xbf16>
    %cst_51 = arith.constant dense<0.000000e+00> : vector<2x128xf32>
    %79 = tpu.matmul %76, %78, %cst_51 {dimension_numbers = #tpu.dot_dimension_numbers<[1], [0], [0], [1], [0, 0, 1, 1], [], []>} : vector<2x160xbf16>, vector<160x128xbf16>, vector<2x128xf32> -> vector<2x128xf32>
    %80 = vector.extract_strided_slice %74 {offsets = [2, 0], sizes = [2, 160], strides = [1, 1]} : vector<10x160xf32> to vector<2x160xf32>
    %81 = arith.truncf %80 : vector<2x160xf32> to vector<2x160xbf16>
    %c1_52 = arith.constant 1 : index
    %c0_53 = arith.constant 0 : index
    %c0_54 = arith.constant 0 : index
    %82 = vector.load %arg8[%c1_52, %c0_53, %c0_54] : memref<5x160x128xbf16, #tpu.memory_space<vmem>>, vector<1x160x128xbf16>
    %83 = vector.shape_cast %82 : vector<1x160x128xbf16> to vector<160x128xbf16>
    %cst_55 = arith.constant dense<0.000000e+00> : vector<2x128xf32>
    %84 = tpu.matmul %81, %83, %cst_55 {dimension_numbers = #tpu.dot_dimension_numbers<[1], [0], [0], [1], [0, 0, 1, 1], [], []>} : vector<2x160xbf16>, vector<160x128xbf16>, vector<2x128xf32> -> vector<2x128xf32>
    %85 = arith.addf %79, %84 : vector<2x128xf32>
    %86 = vector.extract_strided_slice %74 {offsets = [4, 0], sizes = [2, 160], strides = [1, 1]} : vector<10x160xf32> to vector<2x160xf32>
    %87 = arith.truncf %86 : vector<2x160xf32> to vector<2x160xbf16>
    %c2_56 = arith.constant 2 : index
    %c0_57 = arith.constant 0 : index
    %c0_58 = arith.constant 0 : index
    %88 = vector.load %arg8[%c2_56, %c0_57, %c0_58] : memref<5x160x128xbf16, #tpu.memory_space<vmem>>, vector<1x160x128xbf16>
    %89 = vector.shape_cast %88 : vector<1x160x128xbf16> to vector<160x128xbf16>
    %cst_59 = arith.constant dense<0.000000e+00> : vector<2x128xf32>
    %90 = tpu.matmul %87, %89, %cst_59 {dimension_numbers = #tpu.dot_dimension_numbers<[1], [0], [0], [1], [0, 0, 1, 1], [], []>} : vector<2x160xbf16>, vector<160x128xbf16>, vector<2x128xf32> -> vector<2x128xf32>
    %91 = arith.addf %85, %90 : vector<2x128xf32>
    %92 = vector.extract_strided_slice %74 {offsets = [6, 0], sizes = [2, 160], strides = [1, 1]} : vector<10x160xf32> to vector<2x160xf32>
    %93 = arith.truncf %92 : vector<2x160xf32> to vector<2x160xbf16>
    %c3_60 = arith.constant 3 : index
    %c0_61 = arith.constant 0 : index
    %c0_62 = arith.constant 0 : index
    %94 = vector.load %arg8[%c3_60, %c0_61, %c0_62] : memref<5x160x128xbf16, #tpu.memory_space<vmem>>, vector<1x160x128xbf16>
    %95 = vector.shape_cast %94 : vector<1x160x128xbf16> to vector<160x128xbf16>
    %cst_63 = arith.constant dense<0.000000e+00> : vector<2x128xf32>
    %96 = tpu.matmul %93, %95, %cst_63 {dimension_numbers = #tpu.dot_dimension_numbers<[1], [0], [0], [1], [0, 0, 1, 1], [], []>} : vector<2x160xbf16>, vector<160x128xbf16>, vector<2x128xf32> -> vector<2x128xf32>
    %97 = arith.addf %91, %96 : vector<2x128xf32>
    %98 = vector.extract_strided_slice %74 {offsets = [8, 0], sizes = [2, 160], strides = [1, 1]} : vector<10x160xf32> to vector<2x160xf32>
    %99 = arith.truncf %98 : vector<2x160xf32> to vector<2x160xbf16>
    %c4_64 = arith.constant 4 : index
    %c0_65 = arith.constant 0 : index
    %c0_66 = arith.constant 0 : index
    %100 = vector.load %arg8[%c4_64, %c0_65, %c0_66] : memref<5x160x128xbf16, #tpu.memory_space<vmem>>, vector<1x160x128xbf16>
    %101 = vector.shape_cast %100 : vector<1x160x128xbf16> to vector<160x128xbf16>
    %cst_67 = arith.constant dense<0.000000e+00> : vector<2x128xf32>
    %102 = tpu.matmul %99, %101, %cst_67 {dimension_numbers = #tpu.dot_dimension_numbers<[1], [0], [0], [1], [0, 0, 1, 1], [], []>} : vector<2x160xbf16>, vector<160x128xbf16>, vector<2x128xf32> -> vector<2x128xf32>
    %103 = arith.addf %97, %102 : vector<2x128xf32>
    %c0_68 = arith.constant 0 : index
    %c0_69 = arith.constant 0 : index
    %104 = vector.load %arg9[%c0_68, %c0_69] : memref<1x128xf32, #tpu.memory_space<vmem>>, vector<1x128xf32>
    %105 = vector.broadcast %104 : vector<1x128xf32> to vector<2x128xf32>
    %106 = arith.addf %103, %105 : vector<2x128xf32>
    %cst_70 = arith.constant 0.000000e+00 : f32
    %107 = vector.broadcast %cst_70 : f32 to vector<2x128xf32>
    %108 = arith.maximumf %106, %107 : vector<2x128xf32>
    %109 = arith.truncf %108 : vector<2x128xf32> to vector<2x128xbf16>
    %c0_71 = arith.constant 0 : index
    %c0_72 = arith.constant 0 : index
    %110 = vector.load %arg10[%c0_71, %c0_72] : memref<128x128xbf16, #tpu.memory_space<vmem>>, vector<128x128xbf16>
    %cst_73 = arith.constant dense<0.000000e+00> : vector<2x128xf32>
    %111 = tpu.matmul %109, %110, %cst_73 {dimension_numbers = #tpu.dot_dimension_numbers<[1], [0], [0], [1], [0, 0, 1, 1], [], []>} : vector<2x128xbf16>, vector<128x128xbf16>, vector<2x128xf32> -> vector<2x128xf32>
    %c0_74 = arith.constant 0 : index
    %c0_75 = arith.constant 0 : index
    %112 = vector.load %arg11[%c0_74, %c0_75] : memref<1x128xf32, #tpu.memory_space<vmem>>, vector<1x128xf32>
    %113 = vector.broadcast %112 : vector<1x128xf32> to vector<2x128xf32>
    %114 = arith.addf %111, %113 : vector<2x128xf32>
    %cst_76 = arith.constant 0.000000e+00 : f32
    %115 = vector.broadcast %cst_76 : f32 to vector<2x128xf32>
    %116 = arith.maximumf %114, %115 : vector<2x128xf32>
    %117 = arith.truncf %116 : vector<2x128xf32> to vector<2x128xbf16>
    %c0_77 = arith.constant 0 : index
    %c0_78 = arith.constant 0 : index
    %118 = vector.load %arg12[%c0_77, %c0_78] : memref<128x128xbf16, #tpu.memory_space<vmem>>, vector<128x128xbf16>
    %cst_79 = arith.constant dense<0.000000e+00> : vector<2x128xf32>
    %119 = tpu.matmul %117, %118, %cst_79 {dimension_numbers = #tpu.dot_dimension_numbers<[1], [0], [0], [1], [0, 0, 1, 1], [], []>} : vector<2x128xbf16>, vector<128x128xbf16>, vector<2x128xf32> -> vector<2x128xf32>
    %c0_80 = arith.constant 0 : index
    %c0_81 = arith.constant 0 : index
    %120 = vector.load %arg13[%c0_80, %c0_81] : memref<1x128xf32, #tpu.memory_space<vmem>>, vector<1x128xf32>
    %121 = vector.broadcast %120 : vector<1x128xf32> to vector<2x128xf32>
    %122 = arith.addf %119, %121 : vector<2x128xf32>
    %123 = vector.shape_cast %122 : vector<2x128xf32> to vector<1x2x128xf32>
    %c0_82 = arith.constant 0 : index
    %c0_83 = arith.constant 0 : index
    %c0_84 = arith.constant 0 : index
    %124 = vector.load %arg14[%c0_82, %c0_83, %c0_84] : memref<1x2x128xf32, #tpu.memory_space<vmem>>, vector<1x2x128xf32>
    tpu.vector_store %arg14[%c0_82, %c0_83, %c0_84], %123 {strides = array<i32>} : memref<1x2x128xf32, #tpu.memory_space<vmem>>, vector<1x2x128xf32>,
    return
  }
  func.func @transform_0(%arg0: i32) -> (i32, i32) {
    %c0_i32 = arith.constant 0 : i32
    %c0_i32_0 = arith.constant 0 : i32
    return %arg0, %c0_i32 : i32, i32
  }
  func.func @transform_1(%arg0: i32) -> (i32, i32, i32) {
    %c0_i32 = arith.constant 0 : i32
    %c0_i32_0 = arith.constant 0 : i32
    %c0_i32_1 = arith.constant 0 : i32
    %c0_i32_2 = arith.constant 0 : i32
    return %c0_i32, %c0_i32_0, %c0_i32_1 : i32, i32, i32
  }
  func.func @transform_2(%arg0: i32) -> (i32, i32) {
    %c0_i32 = arith.constant 0 : i32
    %c0_i32_0 = arith.constant 0 : i32
    %c0_i32_1 = arith.constant 0 : i32
    return %c0_i32, %c0_i32_0 : i32, i32
  }
  func.func @transform_3(%arg0: i32) -> (i32, i32) {
    %c0_i32 = arith.constant 0 : i32
    %c0_i32_0 = arith.constant 0 : i32
    %c0_i32_1 = arith.constant 0 : i32
    return %c0_i32, %c0_i32_0 : i32, i32
  }
  func.func @transform_4(%arg0: i32) -> (i32, i32, i32) {
    %c0_i32 = arith.constant 0 : i32
    %c0_i32_0 = arith.constant 0 : i32
    %c0_i32_1 = arith.constant 0 : i32
    %c0_i32_2 = arith.constant 0 : i32
    return %c0_i32, %c0_i32_0, %c0_i32_1 : i32, i32, i32
  }
  func.func @transform_5(%arg0: i32) -> (i32, i32) {
    %c0_i32 = arith.constant 0 : i32
    %c0_i32_0 = arith.constant 0 : i32
    %c0_i32_1 = arith.constant 0 : i32
    return %c0_i32, %c0_i32_0 : i32, i32
  }
  func.func @transform_6(%arg0: i32) -> (i32, i32) {
    %c0_i32 = arith.constant 0 : i32
    %c0_i32_0 = arith.constant 0 : i32
    %c0_i32_1 = arith.constant 0 : i32
    return %c0_i32, %c0_i32_0 : i32, i32
  }
  func.func @transform_7(%arg0: i32) -> (i32, i32, i32) {
    %c0_i32 = arith.constant 0 : i32
    %c0_i32_0 = arith.constant 0 : i32
    %c0_i32_1 = arith.constant 0 : i32
    %c0_i32_2 = arith.constant 0 : i32
    return %c0_i32, %c0_i32_0, %c0_i32_1 : i32, i32, i32
  }
  func.func @transform_8(%arg0: i32) -> (i32, i32) {
    %c0_i32 = arith.constant 0 : i32
    %c0_i32_0 = arith.constant 0 : i32
    %c0_i32_1 = arith.constant 0 : i32
    return %c0_i32, %c0_i32_0 : i32, i32
  }
  func.func @transform_9(%arg0: i32) -> (i32, i32) {
    %c0_i32 = arith.constant 0 : i32
    %c0_i32_0 = arith.constant 0 : i32
    %c0_i32_1 = arith.constant 0 : i32
    return %c0_i32, %c0_i32_0 : i32, i32
  }
  func.func @transform_10(%arg0: i32) -> (i32, i32) {
    %c0_i32 = arith.constant 0 : i32
    %c0_i32_0 = arith.constant 0 : i32
    %c0_i32_1 = arith.constant 0 : i32
    return %c0_i32, %c0_i32_0 : i32, i32
  }
  func.func @transform_11(%arg0: i32) -> (i32, i32) {
    %c0_i32 = arith.constant 0 : i32
    %c0_i32_0 = arith.constant 0 : i32
    %c0_i32_1 = arith.constant 0 : i32
    return %c0_i32, %c0_i32_0 : i32, i32
  }
  func.func @transform_12(%arg0: i32) -> (i32, i32) {
    %c0_i32 = arith.constant 0 : i32
    %c0_i32_0 = arith.constant 0 : i32
    %c0_i32_1 = arith.constant 0 : i32
    return %c0_i32, %c0_i32_0 : i32, i32
  }
  func.func @transform_13(%arg0: i32) -> (i32, i32, i32) {
    %c0_i32 = arith.constant 0 : i32
    %c0_i32_0 = arith.constant 0 : i32
    %c0_i32_1 = arith.constant 0 : i32
    return %arg0, %c0_i32, %c0_i32_0 : i32, i32, i32
  }
}

</mosaic_0001>

<bundles_post_ra>
// kernel: lenet_forward.1
= control target key start
LH: loop header
LB: loop body
LE: loop exit
PB: predicated region body
PF: predicated region fallthrough
CT: control target
= control target key end

     0   :  { %18 = vsyncpa [#allocation3], 0  ;;  %s5392_s0 = inlined_call_operand.vmem [shape: f32[128,28], index: 0, kind: input, shape index: {}]   ;;  %s5393_s1 = inlined_call_operand.vmem [shape: bf16[5,28,168], index: 1, kind: input, shape index: {}]   ;;  %s5394_s2 = inlined_call_operand.vmem [shape: f32[1,168], index: 2, kind: input, shape index: {}]   ;;  %s5395_s3 = inlined_call_operand.vmem [shape: bf16[28,60], index: 3, kind: input, shape index: {}]   ;;  %s5396_s4 = inlined_call_operand.vmem [shape: bf16[5,168,160], index: 4, kind: input, shape index: {}]   ;;  %s5397_s5 = inlined_call_operand.vmem [shape: f32[1,160], index: 5, kind: input, shape index: {}]   ;;  %s5398_s6 = inlined_call_operand.vmem [shape: bf16[10,24], index: 6, kind: input, shape index: {}]   ;;  %s5399_s7 = inlined_call_operand.vmem [shape: bf16[5,160,128], index: 7, kind: input, shape index: {}]   ;;  %s5400_s8 = inlined_call_operand.vmem [shape: f32[1,128], index: 8, kind: input, shape index: {}]   ;;  %s5401_s9 = inlined_call_operand.vmem [shape: bf16[128,128], index: 9, kind: input, shape index: {}]   ;;  %s5402_s10 = inlined_call_operand.vmem [shape: f32[1,128], index: 10, kind: input, shape index: {}]   ;;  %s5403_s11 = inlined_call_operand.vmem [shape: bf16[128,128], index: 11, kind: input, shape index: {}]   ;;  %s5404_s12 = inlined_call_operand.vmem [shape: f32[1,128], index: 12, kind: input, shape index: {}]   ;;  %s5405_s13 = inlined_call_operand.hbm [shape: f32[2,2,128], index: 13, kind: output, shape index: {}]  }
   0x1   :  { %20 = vsyncpa [#allocation3 + $0x1], 0  ;;  %s4283_s25 = smov 0   ;;  %s4285_s26 = smov 0  }
   0x2   :  { %s4287_s27 = smov 0   ;;  %s4289_s28 = smov 0  }
   0x3 LB: > { %5412 = sst [smem:[#allocation5_spill]] %s4203_s27  ;;  %s4304_s29 = sadd.s32 4294967295, %s4207_s28   ;;  %s4207_s28 = sphi %s4289_s28, %s5425_s28   ;;  %s4203_s27 = sphi %s4287_s27, %s5427_s27   ;;  %s4199_s26 = sphi %s4285_s26, %s5429_s26   ;;  %s4195_s25 = sphi %s4283_s25, %s5428_s25  }
   0x4   : > { %s3345_s30 = sadd.s32 4294967294, %s4207_s28   ;;  %s4308_s14 = sadd.s32 1, %s4207_s28  }
   0x5   : > { %5413 = sst [smem:[#allocation6_spill]] %s4308_s14  ;;  %s311_s15 = sadd.s32 1, %s4203_s27 }
   0x6   : > { %s308_s16 = ssub.s32 %s4207_s28, %s4308_s14  ;;  %p321_p0 = scmp.ne.s32.totalorder %s4203_s27, %s4199_s26 }
   0x7   : > { %p309_p1 = scmp.eq.s32.totalorder %s308_s16, 0  ;;  %p322_p2 = scmp.eq.s32.totalorder %s4304_s29, 1 }
   0x8   : > { %p327_p3 = scmp.ne.s32.totalorder %s4199_s26, %s4195_s25  ;;  %p328_p4 = scmp.eq.s32.totalorder %s3345_s30, 1 }
   0x9   : > { %s4319_s17 = scalar_select %p309_p1, %s4203_s27, %s311_s15  }
   0xa   : > { %p4321_p5 = por %p322_p2, %p321_p0  ;;  %p4325_p6 = por %p328_p4, %p327_p3 }
   0xb   : > { %5414 = sst [smem:[#allocation7_spill]] %s4319_s17  ;;  %p3348_p7 = scmp.ge.s32.totalorder %s4207_s28, 1 }
   0xc   : > { %p391_p8 = scmp.lt.s32.totalorder %s4207_s28, 3 }
   0xe   : > { %p392_p9 = pnand %p3348_p7, %p391_p8 }
  0x10   : > { %395 = sbr.rel (%p392_p9) target bundleno = 1761 (0x6e1), region = 72 }
  0x15   : > { %v3888_v0 = vld [vmem:[%s5393_s1 + $0x34] ss:$8 sps:$4 sm:$0x3f]   ;;  %vm526_vm0 = vcmask 1045504   ;;  %v5409_v3 = vmov 0   ;;  %s3350_s24 = sshll.u32 %s4304_s29, 3 }
  0x16   : > { %3360 = vmatprep.subr.msk.bf16.mxu0 %vm526_vm0, %v3888_v0  ;;  %v3890_v1 = vld [vmem:[%s5393_s1 + $0x14] ss:$8 sps:$4 sm:$0x3f]   ;;  %v3892_v2 = vld [vmem:[%s5393_s1 + $0x30] ss:$8 sps:$4 sm:$0x3f]   ;;  %565 = vmatprep.mubr.bf16.mxu0 %v5409_v3 }
  0x17   : > { %v3893_v4 = vld [vmem:[%s5393_s1 + $0x10] ss:$8 sps:$4 sm:$0x3f]   ;;  %v3894_v5 = vld [vmem:[%s5393_s1 + $0x24] ss:$8 sps:$4 sm:$0xff]   ;;  %670 = vmatprep.mubr.bf16.mxu1 %v5409_v3  ;;  %3369 = vmatprep.subr.msk.bf16.mxu1 %vm526_vm0, %v3890_v1  ;;  %v528_v6 = vsel %vm526_vm0, %v3892_v2, 0 }
  0x18   : > { %v3896_v7 = vld [vmem:[%s5393_s1 + $0x4] ss:$8 sps:$4 sm:$0xff]   ;;  %546 = vmatpush1.bf16.msra.mxu0 %v528_v6  ;;  %v633_v8 = vsel %vm526_vm0, %v3893_v4, 0  ;;  %v3898_v9 = vld [vmem:[%s5393_s1 + $0x20] ss:$8 sps:$4 sm:$0xff]   ;;  %p436_p10 = scmp.lt.s32.totalorder %s3350_s24, 15 }
  0x19   : > { %651 = vmatpush1.bf16.msra.mxu1 %v633_v8  ;;  %547 = vmatprep.subr.bf16.mxu0 %v3894_v5  ;;  %v3899_v10 = vld [vmem:[%s5393_s1] ss:$8 sps:$4 sm:$0xff]   ;;  %v3900_v11 = vld [vmem:[%s5393_s1 + $0x54] ss:$8 sps:$4 sm:$0x3f]   ;;  %vm513_vm1 = vcmask 228352  }
  0x1a   : > { %652 = vmatprep.subr.bf16.mxu1 %v3896_v7  ;;  %s5431_s24 = smov (!%p436_p10, %s3350_s24), 15  ;;  %v3903_v12 = vld [vmem:[%s5393_s1 + $0x74] ss:$8 sps:$4 sm:$0x3f]   ;;  %v3909_v27 = vld [vmem:[%s5393_s1 + $0x60] ss:$8 sps:$4 sm:$0xff]  }
  0x1b   : > { %s3351_s23 = sshll.u32 %s5431_s24, 3  ;;  %v3905_v13 = vld [vmem:[%s5393_s1 + $0x70] ss:$8 sps:$4 sm:$0x3f]   ;;  %v3911_v28 = vld [vmem:[%s5393_s1 + $0x64] ss:$8 sps:$4 sm:$0xff]  }
  0x1c   : > { %548 = vmatpush1.bf16.msra.mxu0 %v3898_v9  ;;  %s4371_s14 = scalar_lea.vmem %s5392_s0, %s3351_s23  ;;  %v905_v21 = vsel %vm526_vm0, %v3905_v13, 0  ;;  %v3902_v30 = vld [vmem:[%s5393_s1 + $0x50] ss:$8 sps:$4 sm:$0x3f]   ;;  %vm463_vm2 = vsmask.f32 7424 }
  0x1d   : > { %653 = vmatpush1.bf16.msra.mxu1 %v3899_v10  ;;  %3382 = vmatprep.subr.msk.bf16.mxu0 %vm526_vm0, %v3900_v11  ;;  %v442_v14 = vld [vmem:[%s4371_s14] sm:$0xff]  ;;  %v443_v15 = vld [vmem:[%s4371_s14 + $0x8] sm:$0xff]  ;;  %v444_v16 = vld [vmem:[%s4371_s14 + $0x10] sm:$0xff]  ;;  %v759_v38 = vsel %vm526_vm0, %v3902_v30, 0  ;;  %vm858_vm3 = vsmask.f32 6400 }
  0x1e   : > { %3395 = vmatprep.subr.msk.bf16.mxu1 %vm526_vm0, %v3903_v12  ;;  %v445_v17 = vld [vmem:[%s4371_s14 + $0x18] sm:$0xff]  ;;  %v4382_v18 = vpack.c.bf16 %v443_v15, %v442_v14  ;;  %v446_v19 = vld [vmem:[%s4371_s14 + $0x20] sm:$0xff]  ;;  %v447_v20 = vld [vmem:[%s4371_s14 + $0x28] sm:$0xff]  ;;  %vm720_vm4 = vcmask 1046528   ;;  %vm1203_vm5 = vcmask 490496   ;;  %vm1462_vm6 = vcmask 1043456  }
  0x1f   : > { %v4387_v22 = vpack.c.bf16 %v445_v17, %v444_v16  ;;  %v4389_v23 = vpack.c.bf16 %v447_v20, %v446_v19  ;;  %v448_v35 = vld [vmem:[%s4371_s14 + $0x30] sm:$0xff]  ;;  %v449_v36 = vld [vmem:[%s4371_s14 + $0x38] sm:$0xff]  ;;  %v3908_v39 = vld [vmem:[%s5393_s1 + $0x44] ss:$8 sps:$4 sm:$0xff]   ;;  %vm1455_vm7 = vcmask 326656   ;;  %vm2346_vm8 = vcmask 195584  }
  0x20   : > { %v465_v24 = vshrl.u32 %v4382_v18, 16  ;;  %v467_v25 = vshll.u32 %v4382_v18, 16  ;;  %3370 = vmatmul.mubr.msk.bf16.vlgmr.msra.gmra.mxu1 %vm513_vm1, %v4382_v18  ;;  %v4419_v42 = vpack.c.bf16 %v449_v36, %v448_v35  ;;  %v3912_v43 = vld [vmem:[%s5393_s1 + $0x94] ss:$8 sps:$4 sm:$0x3f]   ;;  %v1005_v45 = vrot.slane %v4382_v18, 2 }
  0x21   : > { %v472_v26 = vshll.u32 %v4387_v22, 16  ;;  %680 = vmatprep.mubr.bf16.mxu1 %v5409_v3  ;;  %923 = vmatpush1.bf16.msra.mxu1 %v905_v21  ;;  %v480_v32 = vshll.u32 %v4389_v23, 16  ;;  %v476_v34 = vshrl.u32 %v4387_v22, 16  ;;  %v3906_v44 = vld [vmem:[%s5393_s1 + $0x40] ss:$8 sps:$4 sm:$0xff]   ;;  %v1006_v46 = vrot.slane %v4387_v22, 2 }
  0x22   : > { %v469_v29 = vrot.slane %v467_v25, 1  ;;  %924 = vmatprep.subr.bf16.mxu1 %v3911_v28  ;;  %v1008_v47 = vrot.slane %v4389_v23, 2  ;;  %v1010_v48 = vrot.slane %v4419_v42, 2  ;;  %v484_v49 = vshrl.u32 %v4389_v23, 16  ;;  %v3917_v11 = vld [vmem:[%s5393_s1 + $0x84] ss:$8 sps:$4 sm:$0xff]  }
  0x23   : > { %v474_v31 = vrot.slane %v472_v26, 1  ;;  %v482_v40 = vrot.slane %v480_v32, 1  ;;  %v4434_v50 = vsel %vm526_vm0, %v1005_v45, %v1006_v46  ;;  %v488_v52 = vshll.u32 %v4419_v42, 16  ;;  %v3914_v8 = vld [vmem:[%s5393_s1 + $0x90] ss:$8 sps:$4 sm:$0x3f]  }
  0x24   : > { %v470_v33 = vor.u32 %v469_v29, %v465_v24  ;;  %v4439_v53 = vsel %vm526_vm0, %v1006_v46, %v1008_v47  ;;  %v4444_v54 = vsel %vm526_vm0, %v1008_v47, %v1010_v48  ;;  %v859_v57 = vrot.slane %v465_v24, 1  ;;  %v3915_v16 = vld [vmem:[%s5393_s1 + $0x80] ss:$8 sps:$4 sm:$0xff]   ;;  %v3946_v45 = vld [vmem:[%s5396_s4 + $0xfc] ss:$8 sps:$4 sm:$0xff]   ;;  %s432_s27 = sand.u32 1, %s4199_s26  }
  0x25   : > { %925 = vmatpush1.bf16.msra.mxu1 %v3909_v27  ;;  %v478_v41 = vor.u32 %v476_v34, %v474_v31  ;;  %v486_v55 = vor.u32 %v484_v49, %v482_v40  ;;  %v490_v56 = vrot.slane %v488_v52, 1  ;;  %v860_v59 = vrot.slane %v467_v25, 2  ;;  %v3932_v30 = vld [vmem:[%s5396_s4 + $0x118] ss:$8 sps:$4 sm:$0xff]   ;;  %s3349_s17 = sshll.u32 %s432_s27, 1  ;;  %s3785_s22 = sshll.u32 %s4304_s29, 5 }
  0x26   : > { %v475_v37 = vsel %vm463_vm2, %v470_v33, %v474_v31  ;;  %v863_v60 = vrot.slane %v472_v26, 2  ;;  %v862_v61 = vrot.slane %v476_v34, 1  ;;  %v492_v62 = vshrl.u32 %v4419_v42, 16  ;;  %s434_s23 = scalar_lea.vmem [#allocation2], %s3349_s17  ;;  %s5351_s16 = scalar_lea.hbm %s5405_s13, %s3785_s22 }
  0x27   : > { %3361 = vmatmul.mubr.msk.bf16.vlgmr.msra.gmra.mxu0 %vm513_vm1, %v475_v37  ;;  %v483_v51 = vsel %vm463_vm2, %v478_v41, %v482_v40  ;;  %v491_v58 = vsel %vm463_vm2, %v486_v55, %v490_v56  ;;  %v861_v63 = vor.u32 %v860_v59, %v859_v57  ;;  %v866_v4 = vrot.slane %v484_v49, 1  ;;  %v3958_v57 = vld [vmem:[%s5396_s4 + $0xdc] ss:$8 sps:$4 sm:$0xff]   ;;  %s3286_s30 = sshll.u32 %s434_s23, 4  ;;  %s3273_s24 = scalar_lea.sflag [#allocation3], %s432_s27  ;;  %s5353_s30 = int_to_ptr.vmem [resolvable:$true] %s3286_s30 }
  0x28   : > { %575 = vmatprep.mubr.bf16.mxu0 %v5409_v3  ;;  %3371 = vmatmul.mubr.msk.bf16.gmra.mxu1 %vm513_vm1, %v4387_v22  ;;  %v864_v0 = vor.u32 %v863_v60, %v862_v61  ;;  %v494_v1 = vor.u32 %v492_v62, %v490_v56  ;;  %v867_v5 = vrot.slane %v480_v32, 2  ;;  %v721_v6 = vrot.slane %v4382_v18, 1  ;;  %v3934_v32 = vld [vmem:[%s5396_s4 + $0x11c] ss:$8 sps:$4 sm:$0xff]   ;;  %v3956_v56 = vld [vmem:[%s5396_s4 + $0xd8] ss:$8 sps:$4 sm:$0xff]  }
  0x29   : > { %690 = vmatprep.mubr.bf16.mxu1 %v5409_v3  ;;  %777 = vmatpush1.bf16.msra.mxu0 %v759_v38  ;;  %v722_v7 = vrot.slane %v4387_v22, 1  ;;  %v870_v13 = vrot.slane %v492_v62, 1  ;;  %v871_v14 = vrot.slane %v488_v52, 2  ;;  %v1043_v15 = vsel %vm526_vm0, %v3914_v8, 0  ;;  %v3938_v38 = vld [vmem:[%s5396_s4 + $0x108] ss:$8 sps:$4 sm:$0xff]  }
  0x2a   : > { %778 = vmatprep.subr.bf16.mxu0 %v3908_v39  ;;  %v865_v2 = vsel %vm858_vm3, %v861_v63, %v864_v0  ;;  %v868_v9 = vor.u32 %v867_v5, %v866_v4  ;;  %v724_v17 = vrot.slane %v4389_v23, 1  ;;  %v726_v18 = vrot.slane %v4419_v42, 1  ;;  %v3940_v39 = vld [vmem:[%s5396_s4 + $0x10c] ss:$8 sps:$4 sm:$0xff]   ;;  %v3960_v61 = vld [vmem:[%s5396_s4 + $0xc8] ss:$8 sps:$4 sm:$0xff]  }
  0x2b   : > { %v723_v10 = vsel %vm720_vm4, %v721_v6, %v722_v7  ;;  %v872_v19 = vor.u32 %v871_v14, %v870_v13  ;;  %v3962_v62 = vld [vmem:[%s5396_s4 + $0xcc] ss:$8 sps:$4 sm:$0xff]   ;;  %vm2507_vm9 = vcmask 261120   ;;  %vm4211_vm10 = vmmov 0   ;;  %s4147_s20 = scalar_lea.vmem %s5353_s30, 32  ;;  %s4212_s29 = smov [#allocation2]  }
  0x2c   : > { %v869_v12 = vsel %vm858_vm3, %v864_v0, %v868_v9  ;;  %v725_v20 = vsel %vm720_vm4, %v722_v7, %v724_v17  ;;  %v727_v22 = vsel %vm720_vm4, %v724_v17, %v726_v18  ;;  %p4148_p11 = scmp.ne.s32.totalorder %s5353_s30, %s4147_s20  ;;  %s4151_s17 = sshll.u32 %s4212_s29, 4  ;;  %s4152_s17 = int_to_ptr.vmem [resolvable:$false] %s4151_s17 }
  0x2d   : > { %779 = vmatpush1.bf16.msra.mxu0 %v3906_v44  ;;  %v873_v21 = vsel %vm858_vm3, %v868_v9, %v872_v19  ;;  %v3944_v44 = vld [vmem:[%s5396_s4 + $0xf8] ss:$8 sps:$4 sm:$0xff]   ;;  %s4153_s21 = scalar_lea.vmem %s4152_s17, 64  ;;  %p4154_p0 = scmp.lt.s32.totalorder %s5353_s30, %s4152_s17 }
  0x2e   : > { %3408 = vmatprep.subr.msk.bf16.mxu0 %vm526_vm0, %v3912_v43  ;;  %p4149_p12 = pnand %p4148_p11, %p4321_p5  ;;  %p4155_p1 = scmp.lt.s32.totalorder %s4153_s21, %s4147_s20 }
  0x2f   : > { %3362 = vmatmul.mubr.msk.bf16.gmra.mxu0 %vm513_vm1, %v483_v51  ;;  %v3952_v51 = vld [vmem:[%s5396_s4 + $0xec] ss:$8 sps:$4 sm:$0xff]  }
  0x30   : > { %585 = vmatprep.mubr.bf16.mxu0 %v5409_v3  ;;  %3372 = vmatmul.mubr.msk.bf16.gmra.mxu1 %vm513_vm1, %v4389_v23  ;;  %p4150_p13 = pneg %p4149_p12  ;;  %p4156_p2 = por %p4155_p1, %p4154_p0 }
  0x31   : > { %700 = vmatprep.mubr.bf16.mxu1 %v5409_v3 }
  0x32   : > { %p4157_p3 = pnand %p4156_p2, %p4150_p13 }
  0x37   : > { %3363 = vmatmul.mubr.msk.bf16.gmra.mxu0 %vm513_vm1, %v491_v58 }
  0x38   : > { %595 = vmatprep.mubr.bf16.mxu0 %v5409_v3  ;;  %3373 = vmatmul.mubr.msk.bf16.gmra.mxu1 %vm513_vm1, %v4419_v42 }
  0x39   : > { %942 = vmatprep.mubr.bf16.mxu1 %v5409_v3 }
  0x3f   : > { %3364 = vmatmul.mubr.msk.bf16.gmra.mxu0 %vm513_vm1, %v494_v1 }
  0x40   : > { %796 = vmatprep.mubr.bf16.mxu0 %v5409_v3  ;;  %3396 = vmatmul.mubr.msk.bf16.vlgmr.msra.gmra.mxu1 %vm513_vm1, %v865_v2 }
  0x41   : > { %952 = vmatprep.mubr.bf16.mxu1 %v5409_v3 }
  0x47   : > { %3383 = vmatmul.mubr.msk.bf16.vlgmr.msra.gmra.mxu0 %vm513_vm1, %v723_v10 }
  0x48   : > { %806 = vmatprep.mubr.bf16.mxu0 %v5409_v3  ;;  %3397 = vmatmul.mubr.msk.bf16.gmra.mxu1 %vm513_vm1, %v869_v12 }
  0x49   : > { %962 = vmatprep.mubr.bf16.mxu1 %v5409_v3  ;;  %1061 = vmatpush1.bf16.msra.mxu0 %v1043_v15 }
  0x4a   : > { %1062 = vmatprep.subr.bf16.mxu0 %v3917_v11 }
  0x4d   : > { %1063 = vmatpush1.bf16.msra.mxu0 %v3915_v16 }
  0x4e   : > { %1469 = vmatprep.subr.bf16.mxu0 %v3934_v32 }
  0x4f   : > { %3384 = vmatmul.mubr.msk.bf16.gmra.mxu0 %vm513_vm1, %v725_v20 }
  0x50   : > { %816 = vmatprep.mubr.bf16.mxu0 %v5409_v3  ;;  %3398 = vmatmul.mubr.msk.bf16.gmra.mxu1 %vm513_vm1, %v873_v21 }
  0x51   : > { %972 = vmatprep.mubr.bf16.mxu1 %v5409_v3 }
  0x57   : > { %3385 = vmatmul.mubr.msk.bf16.gmra.mxu0 %vm513_vm1, %v727_v22 }
  0x58   : > { %826 = vmatprep.mubr.bf16.mxu0 %v5409_v3  ;;  %3399 = vmatmul.mubr.msk.bf16.gmra.mxu1 %vm513_vm1, %v872_v19 }
  0x59   : > { %1248 = vmatprep.mubr.bf16.mxu1 %v5409_v3 }
  0x5f   : > { %3386 = vmatmul.mubr.msk.bf16.gmra.mxu0 %vm513_vm1, %v726_v18 }
  0x60   : > { %1080 = vmatprep.mubr.bf16.mxu0 %v5409_v3 }
  0x67   : > { %3409 = vmatmul.mubr.msk.bf16.vlgmr.msra.gmra.mxu0 %vm513_vm1, %v4434_v50  ;;  %v3950_v50 = vld [vmem:[%s5396_s4 + $0xe8] ss:$8 sps:$4 sm:$0xff]  }
  0x68   : > { %1090 = vmatprep.mubr.bf16.mxu0 %v5409_v3  ;;  %1470 = vmatpush1.bf16.msra.mxu0 %v3932_v30  ;;  %v1139_v30 = vlaneseq }
  0x69   : > { %1471 = vmatprep.subr.bf16.mxu0 %v3940_v39 }
  0x6c   : > { %1472 = vmatpush1.bf16.msra.mxu0 %v3938_v38 }
  0x6d   : > { %1473 = vmatprep.subr.bf16.mxu0 %v3946_v45 }
  0x6f   : > { %3410 = vmatmul.mubr.msk.bf16.gmra.mxu0 %vm513_vm1, %v4439_v53 }
  0x70   : > { %1100 = vmatprep.mubr.bf16.mxu0 %v5409_v3  ;;  %1474 = vmatpush1.bf16.msra.mxu0 %v3944_v44  ;;  %v1137_v44 = vld [vmem:[%s5394_s2] sm:$0x3] }
  0x71   : > { %1475 = vmatprep.subr.bf16.mxu0 %v3952_v51 }
  0x74   : > { %1476 = vmatpush1.bf16.msra.mxu0 %v3950_v50 }
  0x75   : > { %1477 = vmatprep.subr.bf16.mxu0 %v3958_v57 }
  0x77   : > { %3411 = vmatmul.mubr.msk.bf16.gmra.mxu0 %vm513_vm1, %v4444_v54 }
  0x78   : > { %1110 = vmatprep.mubr.bf16.mxu0 %v5409_v3  ;;  %1478 = vmatpush1.bf16.msra.mxu0 %v3956_v56 }
  0x79   : > { %1479 = vmatprep.subr.bf16.mxu0 %v3962_v62 }
  0x7c   : > { %1480 = vmatpush1.bf16.msra.mxu0 %v3960_v61 }
  0x7f   : > { %3412 = vmatmul.mubr.msk.bf16.gmra.mxu0 %vm513_vm1, %v1010_v48 }
  0xe0   : > { %v672_v23 = vpop.f32.mrf.mxu1 }
  0xe2   : > { %v674_v24 = vpop.f32.mrf.mxu1 }
  0xe4   : > { %v676_v25 = vpop.f32.mrf.mxu1 }
  0xe6   : > { %v4509_v26 = vpop.f32.mrf.mxu1 }
  0xe7   : > { %v567_v27 = vpop.f32.mrf.mxu0 }
  0xe8   : > { %v673_v28 = vadd.f32 %v672_v23, %v567_v27  ;;  %v4511_v29 = vpop.f32.mrf.mxu1 }
  0xe9   : > { %v569_v31 = vpop.f32.mrf.mxu0 }
  0xea   : > { %v675_v33 = vadd.f32 %v674_v24, %v569_v31  ;;  %v4519_v34 = vpop.f32.mrf.mxu1 }
  0xeb   : > { %v571_v35 = vpop.f32.mrf.mxu0 }
  0xec   : > { %v677_v36 = vadd.f32 %v676_v25, %v571_v35  ;;  %v4521_v37 = vpop.f32.mrf.mxu1 }
  0xed   : > { %v4529_v40 = vpop.f32.mrf.mxu0 }
  0xee   : > { %v4531_v41 = vpop.f32.mrf.mxu1  ;;  %v679_v51 = vadd.f32 %v4509_v26, %v4529_v40 }
  0xef   : > { %v4533_v42 = vpop.f32.mrf.mxu0 }
  0xf0   : > { %v4535_v43 = vpop.f32.mrf.mxu1 }
  0xf1   : > { %v4543_v46 = vpop.f32.mrf.mxu0 }
  0xf2   : > { %v4545_v47 = vpop.f32.mrf.mxu1  ;;  %v685_v3 = vadd.f32 %v4519_v34, %v4543_v46 }
  0xf3   : > { %v4547_v48 = vpop.f32.mrf.mxu0 }
  0xf4   : > { %v4549_v49 = vpop.f32.mrf.mxu1 }
  0xf5   : > { %v4557_v52 = vpop.f32.mrf.mxu0 }
  0xf6   : > { %v4559_v53 = vpop.f32.mrf.mxu1  ;;  %v689_v34 = vadd.f32 %v4531_v41, %v4557_v52 }
  0xf7   : > { %v4561_v54 = vpop.f32.mrf.mxu0 }
  0xf8   : > { %v4563_v55 = vpop.f32.mrf.mxu1 }
  0xf9   : > { %v4571_v58 = vpop.f32.mrf.mxu0 }
  0xfa   : > { %v4575_v60 = vpop.f32.mrf.mxu1  ;;  %v695_v52 = vadd.f32 %v4545_v47, %v4571_v58 }
  0xfb   : > { %v4573_v59 = vpop.f32.mrf.mxu0 }
  0xfc   : > { %v4587_v1 = vpop.f32.mrf.mxu1 }
  0xfd   : > { %v4583_v63 = vpop.f32.mrf.mxu0 }
  0xfe   : > { %v4593_v5 = vpop.f32.mrf.mxu1  ;;  %v699_v47 = vadd.f32 %v4559_v53, %v4583_v63 }
  0xff   : > { %v4585_v0 = vpop.f32.mrf.mxu0  ;;  %5417 = vst [vmem:[#allocation8_spill] sm:$0xff] %v4593_v5 }
 0x100   : > { %v944_v7 = vpop.f32.mrf.mxu1 }
 0x101   : > { %v4589_v2 = vpop.f32.mrf.mxu0 }
 0x102   : > { %v946_v11 = vpop.f32.mrf.mxu1 }
 0x103   : > { %v4591_v4 = vpop.f32.mrf.mxu0 }
 0x104   : > { %v948_v16 = vpop.f32.mrf.mxu1 }
 0x105   : > { %v4595_v6 = vpop.f32.mrf.mxu0 }
 0x106   : > { %v950_v18 = vpop.f32.mrf.mxu1 }
 0x107   : > { %v798_v8 = vpop.f32.mrf.mxu0 }
 0x108   : > { %v837_v9 = vadd.f32 %v798_v8, %v673_v28  ;;  %v954_v21 = vpop.f32.mrf.mxu1  ;;  %v683_v8 = vadd.f32 %v4511_v29, %v4533_v42 }
 0x109   : > { %v800_v10 = vpop.f32.mrf.mxu0 }
 0x10a   : > { %v838_v12 = vadd.f32 %v800_v10, %v675_v33  ;;  %v956_v24 = vpop.f32.mrf.mxu1  ;;  %v4603_v33 = vshrl.u32 %v1139_v30, 7  ;;  %v983_v56 = vadd.f32 %v944_v7, %v837_v9 }
 0x10b   : > { %v802_v13 = vpop.f32.mrf.mxu0 }
 0x10c   : > { %v839_v14 = vadd.f32 %v802_v13, %v677_v36  ;;  %v958_v28 = vpop.f32.mrf.mxu1  ;;  %v5411_v39 = vsub.s32 0, %v4603_v33  ;;  %v1145_v57 = vsub.s32 1, %v4603_v33  ;;  %v984_v10 = vadd.f32 %v946_v11, %v838_v12 }
 0x10d   : > { %v804_v15 = vpop.f32.mrf.mxu0 }
 0x10e   : > { %v960_v35 = vpop.f32.mrf.mxu1  ;;  %v4620_v62 = vrot.slane %v1137_v44, %v5411_v39  ;;  %v840_v13 = vadd.f32 %v804_v15, %v679_v51  ;;  %v985_v26 = vadd.f32 %v948_v16, %v839_v14  ;;  %v4628_v9 = vrot.slane %v1137_v44, %v1145_v57 }
 0x10f   : > { %v808_v17 = vpop.f32.mrf.mxu0  ;;  %v687_v39 = vadd.f32 %v4521_v37, %v4547_v48 }
 0x110   : > { %v964_v45 = vpop.f32.mrf.mxu1  ;;  %v841_v40 = vadd.f32 %v808_v17, %v683_v8  ;;  %v986_v42 = vadd.f32 %v950_v18, %v840_v13 }
 0x111   : > { %v810_v19 = vpop.f32.mrf.mxu0 }
 0x112   : > { %v842_v5 = vadd.f32 %v810_v19, %v685_v3  ;;  %v987_v16 = vadd.f32 %v954_v21, %v841_v40  ;;  %v693_v3 = vadd.f32 %v4535_v43, %v4561_v54  ;;  %v697_v54 = vadd.f32 %v4549_v49, %v4573_v59 }
 0x113   : > { %v812_v20 = vpop.f32.mrf.mxu0 }
 0x114   : > { %v843_v46 = vadd.f32 %v812_v20, %v687_v39  ;;  %v988_v37 = vadd.f32 %v956_v24, %v842_v5 }
 0x115   : > { %v814_v22 = vpop.f32.mrf.mxu0 }
 0x116   : > { %v844_v48 = vadd.f32 %v814_v22, %v689_v34  ;;  %v989_v20 = vadd.f32 %v958_v28, %v843_v46 }
 0x117   : > { %v818_v23 = vpop.f32.mrf.mxu0 }
 0x118   : > { %v845_v21 = vadd.f32 %v818_v23, %v693_v3  ;;  %v990_v24 = vadd.f32 %v960_v35, %v844_v48 }
 0x119   : > { %v820_v25 = vpop.f32.mrf.mxu0 }
 0x11a   : > { %v846_v5 = vadd.f32 %v820_v25, %v695_v52  ;;  %v703_v25 = vadd.f32 %v4563_v55, %v4585_v0 }
 0x11b   : > { %v4597_v27 = vpop.f32.mrf.mxu0 }
 0x11c   : > { %v847_v58 = vadd.f32 %v4597_v27, %v697_v54  ;;  %v705_v27 = vadd.f32 %v4575_v60, %v4589_v2  ;;  %v5420_v2 = vld [vmem:[#allocation8_spill] sm:$0xff] }
 0x11d   : > { %v4599_v31 = vpop.f32.mrf.mxu0 }
 0x11f   : > { %v4601_v32 = vpop.f32.mrf.mxu0 }
 0x120   : > { %v849_v46 = vadd.f32 %v4601_v32, %v703_v25  ;;  %v709_v32 = vadd.f32 %v5420_v2, %v4595_v6 }
 0x121   : > { %v4605_v36 = vpop.f32.mrf.mxu0 }
 0x123   : > { %v4607_v38 = vpop.f32.mrf.mxu0 }
 0x124   : > { %5418 = vst [vmem:[#allocation9_spill] sm:$0xff] %v4607_v38 }
 0x125   : > { %v4613_v50 = vpop.f32.mrf.mxu0 }
 0x126   : > { %5419 = vst [vmem:[#allocation10_spill] sm:$0xff] %v4613_v50  ;;  %v966_v50 = vpop.f32.mrf.mxu1 }
 0x127   : > { %v1082_v61 = vpop.f32.mrf.mxu0  ;;  %v992_v35 = vadd.f32 %v966_v50, %v846_v5  ;;  %v850_v50 = vadd.f32 %v4605_v36, %v705_v27  ;;  %v3920_v27 = vld [vmem:[%s5396_s4 + $0x70] ss:$8 sps:$4 sm:$0xff]  }
 0x128   : > { %v1121_v30 = vadd.f32 %v1082_v61, %v983_v56  ;;  %v968_v14 = vpop.f32.mrf.mxu1 }
 0x129   : > { %v1084_v38 = vpop.f32.mrf.mxu0 }
 0x12a   : > { %v1122_v7 = vadd.f32 %v1084_v38, %v984_v10  ;;  %v1149_v11 = vadd.f32 %v4620_v62, %v1121_v30  ;;  %v970_v39 = vpop.f32.mrf.mxu1 }
 0x12b   : > { %v1086_v29 = vpop.f32.mrf.mxu0 }
 0x12c   : > { %v1123_v12 = vadd.f32 %v1086_v29, %v985_v26  ;;  %v1150_v17 = vadd.f32 %v4628_v9, %v1122_v7  ;;  %v1165_v19 = vmax.f32 %v1149_v11, 0.0  ;;  %v974_v23 = vpop.f32.mrf.mxu1  ;;  %v991_v7 = vadd.f32 %v964_v45, %v845_v21 }
 0x12d   : > { %v1088_v15 = vpop.f32.mrf.mxu0  ;;  %v993_v45 = vadd.f32 %v968_v14, %v847_v58  ;;  %v5421_v14 = vld [vmem:[#allocation9_spill] sm:$0xff]  ;;  %v5422_v52 = vld [vmem:[#allocation10_spill] sm:$0xff] }
 0x12e   : > { %v1151_v38 = vadd.f32 %v4620_v62, %v1123_v12  ;;  %v1124_v44 = vadd.f32 %v1088_v15, %v986_v42  ;;  %v1166_v8 = vmax.f32 %v1150_v17, 0.0  ;;  %v848_v42 = vadd.f32 %v4599_v31, %v699_v47  ;;  %v976_v15 = vpop.f32.mrf.mxu1 }
 0x12f   : > { %v1092_v18 = vpop.f32.mrf.mxu0  ;;  %v707_v31 = vadd.f32 %v4587_v1, %v4591_v4  ;;  %v996_v36 = vadd.f32 %v976_v15, %v850_v50  ;;  %v3919_v15 = vld [vmem:[%s5395_s3 + $0x8] sm:$0x3f]  }
 0x130   : > { %v1167_v51 = vmax.f32 %v1151_v38, 0.0  ;;  %v1152_v56 = vadd.f32 %v4628_v9, %v1124_v44  ;;  %v1125_v41 = vadd.f32 %v1092_v18, %v987_v16  ;;  %v994_v3 = vadd.f32 %v970_v39, %v848_v42  ;;  %v3941_v50 = vld [vmem:[%s5396_s4 + $0x20] ss:$8 sps:$4 sm:$0xff]  }
 0x131   : > { %v1094_v61 = vpop.f32.mrf.mxu0  ;;  %v851_v18 = vadd.f32 %v5421_v14, %v707_v31  ;;  %v3943_v31 = vld [vmem:[%s5396_s4 + $0x24] ss:$8 sps:$4 sm:$0xff]  }
 0x132   : > { %v4642_v10 = vpack.c.bf16 %v1167_v51, %v1165_v19  ;;  %v1168_v13 = vmax.f32 %v1152_v56, 0.0  ;;  %v1126_v43 = vadd.f32 %v1094_v61, %v988_v37  ;;  %v1153_v30 = vadd.f32 %v4620_v62, %v1125_v41  ;;  %v978_v19 = vpop.f32.mrf.mxu1 }
 0x133   : > { %v1096_v22 = vpop.f32.mrf.mxu0  ;;  %v995_v56 = vadd.f32 %v974_v23, %v849_v46  ;;  %v997_v6 = vadd.f32 %v978_v19, %v851_v18  ;;  %v3923_v46 = vld [vmem:[%s5396_s4 + $0x60] ss:$8 sps:$4 sm:$0xff]   ;;  %v3966_v18 = vld [vmem:[%s5396_s4 + $0x94] ss:$8 sps:$4 sm:$0xff]   ;;  %v3964_v19 = vld [vmem:[%s5396_s4 + $0x90] ss:$8 sps:$4 sm:$0xff]  }
 0x134   : > { %v1127_v26 = vadd.f32 %v1096_v22, %v989_v20  ;;  %v4647_v40 = vpack.c.bf16 %v1168_v13, %v1166_v8  ;;  %v1154_v29 = vadd.f32 %v4628_v9, %v1126_v43  ;;  %v1169_v12 = vmax.f32 %v1153_v30, 0.0  ;;  %v980_v43 = vpop.f32.mrf.mxu1 }
 0x135   : > { %v1098_v28 = vpop.f32.mrf.mxu0  ;;  %v852_v20 = vadd.f32 %v5422_v52, %v709_v32  ;;  %v3978_v52 = vld [vmem:[%s5396_s4 + $0x26c] ss:$8 sps:$4 sm:$0xff]  }
 0x136   : > { %v1155_v49 = vadd.f32 %v4620_v62, %v1127_v26  ;;  %v1128_v59 = vadd.f32 %v1098_v28, %v990_v24  ;;  %v1170_v17 = vmax.f32 %v1154_v29, 0.0 }
 0x137   : > { %v1102_v11 = vpop.f32.mrf.mxu0  ;;  %v998_v47 = vadd.f32 %v980_v43, %v852_v20  ;;  %v3438_v20 = vld [vmem:[%s5396_s4 + $0x148] sm:$0xff] }
 0x138   : > { %v1171_v34 = vmax.f32 %v1155_v49, 0.0  ;;  %v1156_v53 = vadd.f32 %v4628_v9, %v1128_v59  ;;  %v1129_v63 = vadd.f32 %v1102_v11, %v991_v7  ;;  %v3992_v43 = vld [vmem:[%s5396_s4 + $0x12c] ss:$8 sps:$4 sm:$0xff]  }
 0x139   : > { %v1104_v16 = vpop.f32.mrf.mxu0 }
 0x13a   : > { %v1187_v38 = vpack.c.bf16 %v1171_v34, %v1169_v12  ;;  %v1172_v55 = vmax.f32 %v1156_v53, 0.0  ;;  %v1130_v0 = vadd.f32 %v1104_v16, %v992_v35  ;;  %v1157_v37 = vadd.f32 %v4620_v62, %v1129_v63  ;;  %v3926_v16 = vld [vmem:[%s5396_s4 + $0x50] ss:$8 sps:$4 sm:$0xff]  }
 0x13b   : > { %v1106_v44 = vpop.f32.mrf.mxu0 }
 0x13c   : > { %v1131_v48 = vadd.f32 %v1106_v44, %v993_v45  ;;  %v1188_v60 = vpack.c.bf16 %v1172_v55, %v1170_v17  ;;  %v1158_v41 = vadd.f32 %v4628_v9, %v1130_v0  ;;  %v1173_v39 = vmax.f32 %v1157_v37, 0.0  ;;  %v3931_v17 = vld [vmem:[%s5396_s4 + $0x44] ss:$8 sps:$4 sm:$0xff]   ;;  %v3937_v55 = vld [vmem:[%s5396_s4 + $0x34] ss:$8 sps:$4 sm:$0xff]  }
 0x13d   : > { %v1108_v51 = vpop.f32.mrf.mxu0  ;;  %v5423_v45 = vmov 0   ;;  %v3935_v0 = vld [vmem:[%s5396_s4 + $0x30] ss:$8 sps:$4 sm:$0xff]   ;;  %v3949_v44 = vld [vmem:[%s5396_s4 + $0x14] ss:$8 sps:$4 sm:$0xff]  }
 0x13e   : > { %v1159_v1 = vadd.f32 %v4620_v62, %v1131_v48  ;;  %v1132_v4 = vadd.f32 %v1108_v51, %v994_v3  ;;  %v1174_v5 = vmax.f32 %v1158_v41, 0.0  ;;  %v3947_v3 = vld [vmem:[%s5396_s4 + $0x10] ss:$8 sps:$4 sm:$0xff]   ;;  %v3955_v37 = vld [vmem:[%s5396_s4 + $0x4] ss:$8 sps:$4 sm:$0xff]  }
 0x13f   : > { %v1112_v21 = vpop.f32.mrf.mxu0  ;;  %v1293_v48 = vld [vmem:[%s5396_s4 + $0xa0] sm:$0xff] }
 0x140   : > { %v1175_v61 = vmax.f32 %v1159_v1, 0.0  ;;  %v1160_v8 = vadd.f32 %v4628_v9, %v1132_v4  ;;  %v1133_v13 = vadd.f32 %v1112_v21, %v995_v56  ;;  %v3485_v2 = vcombine.high %v1293_v48, %v1293_v48  ;;  %v3969_v51 = vld [vmem:[%s5396_s4 + $0xbc] ss:$8 sps:$4 sm:$0xff]   ;;  %v3967_v56 = vld [vmem:[%s5396_s4 + $0xb8] ss:$8 sps:$4 sm:$0xff]  }
 0x141   : > { %v1114_v54 = vpop.f32.mrf.mxu0  ;;  %v3484_v32 = vcombine.low %v1293_v48, %v1293_v48  ;;  %1481 = vmatprep.subr.bf16.mxu0 %v3969_v51  ;;  %v3972_v41 = vld [vmem:[%s5396_s4 + $0x84] ss:$8 sps:$4 sm:$0xff]   ;;  %v3970_v1 = vld [vmem:[%s5396_s4 + $0x80] ss:$8 sps:$4 sm:$0xff]   ;;  %v3460_v21 = vcombine.high %v3438_v20, %v3438_v20 }
 0x142   : > { %v1189_v22 = vpack.c.bf16 %v1175_v61, %v1173_v39  ;;  %v1176_v24 = vmax.f32 %v1160_v8, 0.0  ;;  %v1134_v30 = vadd.f32 %v1114_v54, %v996_v36  ;;  %v1161_v58 = vadd.f32 %v4620_v62, %v1133_v13  ;;  %1482 = vmatpush1.bf16.msra.mxu0 %v3967_v56  ;;  %v3975_v4 = vld [vmem:[%s5396_s4 + $0xac] ss:$8 sps:$4 sm:$0xff]   ;;  %v3973_v36 = vld [vmem:[%s5396_s4 + $0xa8] ss:$8 sps:$4 sm:$0xff]  }
 0x143   : > { %v1116_v26 = vpop.f32.mrf.mxu0  ;;  %v1631_v14 = vsel %vm1462_vm6, %v3484_v32, 0  ;;  %1483 = vmatprep.subr.bf16.mxu0 %v3975_v4  ;;  %v3459_v39 = vcombine.low %v3438_v20, %v3438_v20  ;;  %v3986_v8 = vld [vmem:[%s5396_s4 + $0x13c] ss:$8 sps:$4 sm:$0xff]   ;;  %v3984_v13 = vld [vmem:[%s5396_s4 + $0x138] ss:$8 sps:$4 sm:$0xff]  }
 0x144   : > { %v1135_v23 = vadd.f32 %v1116_v26, %v997_v6  ;;  %v1190_v28 = vpack.c.bf16 %v1176_v24, %v1174_v5  ;;  %v1162_v29 = vadd.f32 %v4628_v9, %v1134_v30  ;;  %v1177_v25 = vmax.f32 %v1161_v58, 0.0  ;;  %v3990_v6 = vld [vmem:[%s5396_s4 + $0x128] ss:$8 sps:$4 sm:$0xff]   ;;  %v3998_v54 = vld [vmem:[%s5396_s4 + $0x1c4] ss:$8 sps:$4 sm:$0xff]  }
 0x145   : > { %v1118_v7 = vpop.f32.mrf.mxu0  ;;  %v1464_v61 = vsel %vm1462_vm6, %v3459_v39, 0  ;;  %v4001_v51 = vld [vmem:[%s5396_s4 + $0x22c] ss:$8 sps:$4 sm:$0xff]   ;;  %v4007_v20 = vld [vmem:[%s5396_s4 + $0x21c] ss:$8 sps:$4 sm:$0xff]  }
 0x146   : > { %v1163_v49 = vadd.f32 %v4620_v62, %v1135_v23  ;;  %v1136_v59 = vadd.f32 %v1118_v7, %v998_v47  ;;  %v1178_v11 = vmax.f32 %v1162_v29, 0.0  ;;  %v3922_v62 = vld [vmem:[%s5396_s4 + $0x74] ss:$8 sps:$4 sm:$0xff]   ;;  %1484 = vmatpush1.bf16.msra.mxu0 %v3973_v36  ;;  %v3976_v47 = vld [vmem:[%s5396_s4 + $0x268] ss:$8 sps:$4 sm:$0xff]  }
 0x147   : > { %3461 = vmatprep.subr.msk.bf16.mxu0 %vm1462_vm6, %v3460_v21  ;;  %v3999_v36 = vld [vmem:[%s5396_s4 + $0x228] ss:$8 sps:$4 sm:$0xff]   ;;  %v4010_v21 = vld [vmem:[%s5396_s4 + $0x1a4] ss:$8 sps:$4 sm:$0xff]   ;;  %v4005_v39 = vld [vmem:[%s5396_s4 + $0x218] ss:$8 sps:$4 sm:$0xff]  }
 0x148   : > { %v1179_v35 = vmax.f32 %v1163_v49, 0.0  ;;  %v1164_v42 = vadd.f32 %v4628_v9, %v1136_v59  ;;  %v3918_v9 = vld [vmem:[%s5395_s3] sm:$0xff]  }
 0x149   : > { %v3981_v49 = vld [vmem:[%s5396_s4 + $0x258] ss:$8 sps:$4 sm:$0xff]  }
 0x14a   : > { %v1191_v12 = vpack.c.bf16 %v1179_v35, %v1177_v25  ;;  %v1180_v34 = vmax.f32 %v1164_v42, 0.0  ;;  %1496 = vmatpush2.bf16.msra.mxu0 %v1464_v61  ;;  %v3989_v42 = vld [vmem:[%s5396_s4 + $0x24c] ss:$8 sps:$4 sm:$0xff]  }
 0x14b   : > { %1497 = vmatprep.subr.bf16.mxu0 %v3986_v8 }
 0x14c   : > { %v1192_v53 = vpack.c.bf16 %v1180_v34, %v1178_v11  ;;  %v1211_v63 = vsel %vm526_vm0, %v1191_v12, 0 }
 0x14e   : > { %3415 = vmatprep.subr.msk.bf16.mxu1 %vm526_vm0, %v1192_v53  ;;  %1498 = vmatpush2.bf16.msra.mxu0 %v3984_v13  ;;  %v4008_v13 = vld [vmem:[%s5396_s4 + $0x1a0] ss:$8 sps:$4 sm:$0xff]  }
 0x14f   : > { %1225 = vmatpush1.bf16.msra.mxu1 %v1211_v63  ;;  %1499 = vmatprep.subr.bf16.mxu0 %v3992_v43 }
 0x150   : > { %1226 = vmatprep.subr.bf16.mxu1 %v1190_v28  ;;  %v3983_v28 = vld [vmem:[%s5396_s4 + $0x25c] ss:$8 sps:$4 sm:$0xff]  }
 0x152   : > { %1500 = vmatpush2.bf16.msra.mxu0 %v3990_v6 }
 0x153   : > { %1227 = vmatpush1.bf16.msra.mxu1 %v1189_v22  ;;  %1838 = vmatprep.subr.bf16.mxu0 %v3998_v54  ;;  %v4013_v54 = vld [vmem:[%s5396_s4 + $0x20c] ss:$8 sps:$4 sm:$0xff]  }
 0x154   : > { %1228 = vmatprep.subr.bf16.mxu1 %v1188_v60  ;;  %v3953_v60 = vld [vmem:[%s5396_s4] ss:$8 sps:$4 sm:$0xff]  }
 0x157   : > { %1229 = vmatpush1.bf16.msra.mxu1 %v1187_v38  ;;  %v3929_v38 = vld [vmem:[%s5396_s4 + $0x40] ss:$8 sps:$4 sm:$0xff]  }
 0x158   : > { %1230 = vmatprep.subr.bf16.mxu1 %v4647_v40  ;;  %v3925_v40 = vld [vmem:[%s5396_s4 + $0x64] ss:$8 sps:$4 sm:$0xff]  }
 0x15b   : > { %1231 = vmatpush1.bf16.msra.mxu1 %v4642_v10  ;;  %v3928_v10 = vld [vmem:[%s5396_s4 + $0x54] ss:$8 sps:$4 sm:$0xff]  }
 0x15c   : > { %1636 = vmatprep.subr.bf16.mxu1 %v3922_v62  ;;  %v3987_v62 = vld [vmem:[%s5396_s4 + $0x248] ss:$8 sps:$4 sm:$0xff]  }
 0x15e   : > { %3416 = vmatmul.mubr.msk.bf16.vlgmr.msra.gmra.mxu1 %vm1203_vm5, %v3918_v9 }
 0x15f   : > { %1258 = vmatprep.mubr.bf16.mxu1 %v5423_v45  ;;  %1637 = vmatpush1.bf16.msra.mxu1 %v3920_v27 }
 0x160   : > { %1638 = vmatprep.subr.bf16.mxu1 %v3925_v40  ;;  %v3995_v40 = vld [vmem:[%s5396_s4 + $0x23c] ss:$8 sps:$4 sm:$0xff]  }
 0x163   : > { %1639 = vmatpush1.bf16.msra.mxu1 %v3923_v46 }
 0x164   : > { %1640 = vmatprep.subr.bf16.mxu1 %v3928_v10 }
 0x166   : > { %3417 = vmatmul.mubr.msk.bf16.gmra.mxu1 %vm1203_vm5, %v3919_v15 }
 0x167   : > { %1641 = vmatpush1.bf16.msra.mxu1 %v3926_v16 }
 0x168   : > { %1642 = vmatprep.subr.bf16.mxu1 %v3931_v17 }
 0x16b   : > { %1643 = vmatpush1.bf16.msra.mxu1 %v3929_v38 }
 0x16c   : > { %1644 = vmatprep.subr.bf16.mxu1 %v3937_v55 }
 0x16f   : > { %1645 = vmatpush1.bf16.msra.mxu1 %v3935_v0 }
 0x170   : > { %1646 = vmatprep.subr.bf16.mxu1 %v3943_v31 }
 0x173   : > { %1647 = vmatpush1.bf16.msra.mxu1 %v3941_v50  ;;  %v3993_v50 = vld [vmem:[%s5396_s4 + $0x238] ss:$8 sps:$4 sm:$0xff]  }
 0x174   : > { %1648 = vmatprep.subr.bf16.mxu1 %v3949_v44 }
 0x177   : > { %1649 = vmatpush1.bf16.msra.mxu1 %v3947_v3 }
 0x178   : > { %1650 = vmatprep.subr.bf16.mxu1 %v3955_v37 }
 0x17b   : > { %1651 = vmatpush1.bf16.msra.mxu1 %v3953_v60  ;;  %v3996_v60 = vld [vmem:[%s5396_s4 + $0x1c0] ss:$8 sps:$4 sm:$0xff]  }
 0x17c   : > { %3486 = vmatprep.subr.msk.bf16.mxu1 %vm1462_vm6, %v3485_v2 }
 0x17f   : > { %1663 = vmatpush2.bf16.msra.mxu1 %v1631_v14 }
 0x180   : > { %1664 = vmatprep.subr.bf16.mxu1 %v3966_v18 }
 0x183   : > { %1665 = vmatpush2.bf16.msra.mxu1 %v3964_v19 }
 0x184   : > { %1666 = vmatprep.subr.bf16.mxu1 %v3972_v41 }
 0x187   : > { %1667 = vmatpush2.bf16.msra.mxu1 %v3970_v1  ;;  %v4004_v1 = vld [vmem:[%s5396_s4 + $0x1b4] ss:$8 sps:$4 sm:$0xff]  }
 0x188   : > { %2050 = vmatprep.subr.bf16.mxu1 %v3978_v52  ;;  %v4002_v52 = vld [vmem:[%s5396_s4 + $0x1b0] ss:$8 sps:$4 sm:$0xff]  }
 0x21e   : > { %v1250_v5 = vpop.f32.mrf.mxu1 }
 0x220   : > { %v1252_v22 = vpop.f32.mrf.mxu1 }
 0x222   : > { %v1254_v24 = vpop.f32.mrf.mxu1 }
 0x223   : > { %v4792_v58 = vpack.c.bf16 %v1254_v24, %v1250_v5  ;;  %v4016_v5 = vld [vmem:[%s5396_s4 + $0x194] ss:$8 sps:$4 sm:$0xff]   ;;  %v4011_v24 = vld [vmem:[%s5396_s4 + $0x208] ss:$8 sps:$4 sm:$0xff]  }
 0x224   : > { %v1256_v30 = vpop.f32.mrf.mxu1 }
 0x225   : > { %v4787_v26 = vpack.c.bf16 %v1256_v30, %v1252_v22  ;;  %v1321_v25 = vshll.u32 %v4792_v58, 16  ;;  %v1319_v55 = vshrl.u32 %v4792_v58, 16  ;;  %v2129_v31 = vrot.slane %v4792_v58, 2  ;;  %v4014_v30 = vld [vmem:[%s5396_s4 + $0x190] ss:$8 sps:$4 sm:$0xff]  }
 0x226   : > { %v1260_v23 = vpop.f32.mrf.mxu1 }
 0x227   : > { %3487 = vmatprep.mubr.msk.bf16.mxu1 %vm1455_vm7, %v4787_v26  ;;  %v1333_v59 = vshll.u32 %v4787_v26, 16  ;;  %v1331_v11 = vshrl.u32 %v4787_v26, 16  ;;  %v1271_v27 = vpack.c.bf16 %v1260_v23, %v1260_v23  ;;  %v1323_v46 = vrot.slane %v1321_v25, 1 }
 0x228   : > { %v1262_v7 = vpop.f32.mrf.mxu1  ;;  %1669 = vmatmul.mubr.bf16.vlgmr.msra.gmra.mxu1 %v4792_v58  ;;  %v1716_v43 = vrot.slane %v4787_v26, 1 }
 0x229   : > { %v1272_v29 = vpack.c.bf16 %v1262_v7, %v1262_v7  ;;  %2051 = vmatpush1.bf16.msra.mxu1 %v3976_v47  ;;  %v1335_v9 = vrot.slane %v1333_v59, 1  ;;  %v1924_v10 = vrot.slane %v1331_v11, 1  ;;  %v1925_v15 = vrot.slane %v1333_v59, 2  ;;  %v4019_v47 = vld [vmem:[%s5396_s4 + $0x1fc] ss:$8 sps:$4 sm:$0xff]  }
 0x22a   : > { %v1264_v35 = vpop.f32.mrf.mxu1  ;;  %2052 = vmatprep.subr.bf16.mxu1 %v3983_v28  ;;  %v1324_v2 = vor.u32 %v1323_v46, %v1319_v55  ;;  %v3555_v28 = vld [vmem:[%s5396_s4 + $0x298] sm:$0xff] }
 0x22b   : > { %v4809_v12 = vpack.c.bf16 %v1264_v35, %v1260_v23  ;;  %3488 = vmatprep.mubr.msk.bf16.mxu1 %vm1455_vm7, %v1272_v29  ;;  %v1336_v44 = vor.u32 %v1335_v9, %v1331_v11  ;;  %v1926_v32 = vor.u32 %v1925_v15, %v1924_v10  ;;  %v4022_v23 = vld [vmem:[%s5396_s4 + $0x184] ss:$8 sps:$4 sm:$0xff]   ;;  %v4020_v29 = vld [vmem:[%s5396_s4 + $0x180] ss:$8 sps:$4 sm:$0xff]   ;;  %v3576_v59 = vcombine.low %v3555_v28, %v3555_v28  ;;  %v4026_v35 = vld [vmem:[%s5396_s4 + $0x174] ss:$8 sps:$4 sm:$0xff]  }
 0x22c   : > { %v1266_v34 = vpop.f32.mrf.mxu1  ;;  %v4028_v9 = vld [vmem:[%s5396_s4 + $0x288] ss:$8 sps:$4 sm:$0xff]   ;;  %v4039_v15 = vld [vmem:[%s5396_s4 + $0x154] ss:$8 sps:$4 sm:$0xff]  }
 0x22d   : > { %v1326_v53 = vshll.u32 %v4809_v12, 16  ;;  %v4813_v63 = vpack.c.bf16 %v1266_v34, %v1262_v7  ;;  %2053 = vmatpush1.bf16.msra.mxu1 %v3981_v49  ;;  %v2130_v16 = vrot.slane %v4809_v12, 2  ;;  %v1342_v61 = vshrl.u32 %v4809_v12, 16  ;;  %v4017_v7 = vld [vmem:[%s5396_s4 + $0x1f8] ss:$8 sps:$4 sm:$0xff]  }
 0x22e   : > { %2054 = vmatprep.subr.bf16.mxu1 %v3989_v42  ;;  %v3577_v49 = vcombine.high %v3555_v28, %v3555_v28  ;;  %v4024_v42 = vld [vmem:[%s5396_s4 + $0x170] ss:$8 sps:$4 sm:$0xff]   ;;  %v2045_v11 = vsel %vm1462_vm6, %v3576_v59, 0  ;;  %v4030_v34 = vld [vmem:[%s5396_s4 + $0x28c] ss:$8 sps:$4 sm:$0xff]  }
 0x22f   : > { %v1338_v17 = vshll.u32 %v4813_v63, 16  ;;  %v1345_v38 = vshrl.u32 %v4813_v63, 16  ;;  %v1328_v0 = vrot.slane %v1326_v53, 1  ;;  %v4847_v56 = vsel %vm526_vm0, %v2129_v31, %v2130_v16  ;;  %v4037_v31 = vld [vmem:[%s5396_s4 + $0x150] ss:$8 sps:$4 sm:$0xff]  }
 0x230   : > { %1679 = vmatmul.mubr.bf16.gmra.mxu1 %v1271_v27  ;;  %v1717_v8 = vrot.slane %v4813_v63, 1  ;;  %v4031_v27 = vld [vmem:[%s5396_s4 + $0x160] ss:$8 sps:$4 sm:$0xff]   ;;  %v1921_v46 = vrot.slane %v1326_v53, 2  ;;  %v1920_v10 = vrot.slane %v1342_v61, 1  ;;  %v1918_v53 = vrot.slane %v1321_v25, 2 }
 0x231   : > { %2055 = vmatpush1.bf16.msra.mxu1 %v3987_v62  ;;  %v1340_v3 = vrot.slane %v1338_v17, 1  ;;  %v1927_v37 = vrot.slane %v1345_v38, 1  ;;  %v1928_v48 = vrot.slane %v1338_v17, 2  ;;  %v1329_v41 = vsel %vm463_vm2, %v1324_v2, %v1328_v0  ;;  %v4033_v62 = vld [vmem:[%s5396_s4 + $0x164] ss:$8 sps:$4 sm:$0xff]   ;;  %v3509_v17 = vld [vmem:[%s5396_s4 + $0x1f0] sm:$0xff] }
 0x232   : > { %2056 = vmatprep.subr.bf16.mxu1 %v3995_v40  ;;  %v1344_v6 = vor.u32 %v1342_v61, %v1328_v0  ;;  %v1718_v22 = vsel %vm720_vm4, %v1716_v43, %v1717_v8  ;;  %v4036_v40 = vld [vmem:[%s5396_s4 + $0x27c] ss:$8 sps:$4 sm:$0xff]   ;;  %v1917_v0 = vrot.slane %v1319_v55, 1  ;;  %v4066_v43 = vld [vmem:[%s5396_s4 + $0x2b0] ss:$8 sps:$4 sm:$0xff]  }
 0x233   : > { %v1341_v14 = vsel %vm463_vm2, %v1336_v44, %v1340_v3  ;;  %v1347_v18 = vor.u32 %v1345_v38, %v1340_v3  ;;  %v4839_v19 = vor.u32 %v1928_v48, %v1927_v37  ;;  %v4034_v38 = vld [vmem:[%s5396_s4 + $0x278] ss:$8 sps:$4 sm:$0xff]   ;;  %v3531_v44 = vcombine.high %v3509_v17, %v3509_v17  ;;  %v4044_v25 = vld [vmem:[%s5396_s4 + $0x1e4] ss:$8 sps:$4 sm:$0xff]   ;;  %v4047_v2 = vld [vmem:[%s5396_s4 + $0x1d4] ss:$8 sps:$4 sm:$0xff]  }
 0x234   : > { %3462 = vmatprep.mubr.msk.bf16.mxu0 %vm1455_vm7, %v1341_v14  ;;  %v3530_v3 = vcombine.low %v3509_v17, %v3509_v17  ;;  %v1919_v37 = vor.u32 %v1918_v53, %v1917_v0  ;;  %v4050_v14 = vld [vmem:[%s5396_s4 + $0x314] ss:$8 sps:$4 sm:$0xff]   ;;  %v4074_v28 = vld [vmem:[%s5396_s4 + $0x330] ss:$8 sps:$4 sm:$0xff]  }
 0x235   : > { %2057 = vmatpush1.bf16.msra.mxu1 %v3993_v50  ;;  %1502 = vmatmul.mubr.bf16.vlgmr.msra.gmra.mxu0 %v1329_v41  ;;  %v1930_v4 = vsel %vm858_vm3, %v1926_v32, %v4839_v19  ;;  %v1922_v50 = vor.u32 %v1921_v46, %v1920_v10  ;;  %v4045_v32 = vld [vmem:[%s5396_s4 + $0x1d0] ss:$8 sps:$4 sm:$0xff]   ;;  %v4053_v41 = vld [vmem:[%s5396_s4 + $0x304] ss:$8 sps:$4 sm:$0xff]   ;;  %v4062_v61 = vld [vmem:[%s5396_s4 + $0x2d4] ss:$8 sps:$4 sm:$0xff]  }
 0x236   : > { %1839 = vmatpush1.bf16.msra.mxu0 %v3996_v60  ;;  %3463 = vmatprep.mubr.msk.bf16.mxu0 %vm1455_vm7, %v1347_v18  ;;  %v1833_v55 = vsel %vm1462_vm6, %v3530_v3, 0  ;;  %v4042_v60 = vld [vmem:[%s5396_s4 + $0x1e0] ss:$8 sps:$4 sm:$0xff]   ;;  %v1714_v18 = vrot.slane %v4809_v12, 1  ;;  %v4081_v59 = vld [vmem:[%s5399_s7 + $0x38] sm:$0xff]   ;;  %v4091_v53 = vld [vmem:[%s5399_s7 + $0x10] sm:$0xff]  }
 0x237   : > { %3579 = vmatprep.mubr.msk.bf16.mxu1 %vm1455_vm7, %v1930_v4  ;;  %2058 = vmatprep.subr.bf16.mxu1 %v4001_v51  ;;  %v1923_v48 = vsel %vm858_vm3, %v1919_v37, %v1922_v50  ;;  %v4048_v51 = vld [vmem:[%s5396_s4 + $0x310] ss:$8 sps:$4 sm:$0xff]   ;;  %v4056_v4 = vld [vmem:[%s5396_s4 + $0x2f4] ss:$8 sps:$4 sm:$0xff]   ;;  %v4085_v12 = vld [vmem:[%s5399_s7 + $0x28] sm:$0xff]  }
 0x238   : > { %1840 = vmatprep.subr.bf16.mxu0 %v4004_v1  ;;  %v4089_v10 = vld [vmem:[%s5399_s7 + $0x18] sm:$0xff]   ;;  %v4093_v37 = vld [vmem:[%s5399_s7 + $0x8] sm:$0xff]  }
 0x239   : > { %2059 = vmatpush1.bf16.msra.mxu1 %v3999_v36  ;;  %v2133_v36 = vrot.slane %v4813_v63, 2  ;;  %v4057_v63 = vld [vmem:[%s5396_s4 + $0x2e0] ss:$8 sps:$4 sm:$0xff]  }
 0x23a   : > { %1841 = vmatpush1.bf16.msra.mxu0 %v4002_v52  ;;  %2060 = vmatprep.subr.bf16.mxu1 %v4007_v20  ;;  %v4054_v52 = vld [vmem:[%s5396_s4 + $0x2f0] ss:$8 sps:$4 sm:$0xff]   ;;  %v2132_v20 = vrot.slane %v4787_v26, 2 }
 0x23b   : > { %1842 = vmatprep.subr.bf16.mxu0 %v4010_v21  ;;  %v4059_v21 = vld [vmem:[%s5396_s4 + $0x2e4] ss:$8 sps:$4 sm:$0xff]   ;;  %v4060_v26 = vld [vmem:[%s5396_s4 + $0x2d0] ss:$8 sps:$4 sm:$0xff]  }
 0x23d   : > { %2061 = vmatpush1.bf16.msra.mxu1 %v4005_v39  ;;  %1512 = vmatmul.mubr.bf16.gmra.mxu0 %v1344_v6  ;;  %v2134_v39 = vsel %vm526_vm0, %v2132_v20, %v2133_v36  ;;  %v4068_v6 = vld [vmem:[%s5396_s4 + $0x2b4] ss:$8 sps:$4 sm:$0xff]  }
 0x23e   : > { %1843 = vmatpush1.bf16.msra.mxu0 %v4008_v13  ;;  %3533 = vmatprep.mubr.msk.bf16.mxu0 %vm1455_vm7, %v1718_v22  ;;  %v4063_v13 = vld [vmem:[%s5396_s4 + $0x2c0] ss:$8 sps:$4 sm:$0xff]  }
 0x23f   : > { %2062 = vmatprep.subr.bf16.mxu1 %v4013_v54  ;;  %1844 = vmatprep.subr.bf16.mxu0 %v4016_v5  ;;  %v4071_v54 = vld [vmem:[%s5396_s4 + $0x2a4] ss:$8 sps:$4 sm:$0xff]   ;;  %v4069_v22 = vld [vmem:[%s5396_s4 + $0x2a0] ss:$8 sps:$4 sm:$0xff]  }
 0x240   : > { %v3601_v5 = vld [vmem:[%s5396_s4 + $0x340] sm:$0xff] }
 0x241   : > { %2063 = vmatpush1.bf16.msra.mxu1 %v4011_v24  ;;  %v3623_v24 = vcombine.high %v3601_v5, %v3601_v5 }
 0x242   : > { %1845 = vmatpush1.bf16.msra.mxu0 %v4014_v30  ;;  %2064 = vmatprep.subr.bf16.mxu1 %v4019_v47  ;;  %v3622_v30 = vcombine.low %v3601_v5, %v3601_v5 }
 0x243   : > { %1846 = vmatprep.subr.bf16.mxu0 %v4022_v23  ;;  %v4076_v23 = vld [vmem:[%s5396_s4 + $0x334] ss:$8 sps:$4 sm:$0xff]  }
 0x244   : > { %v2249_v47 = vsel %vm1462_vm6, %v3622_v30, 0 }
 0x245   : > { %2065 = vmatpush1.bf16.msra.mxu1 %v4017_v7  ;;  %v4079_v7 = vld [vmem:[%s5396_s4 + $0x324] ss:$8 sps:$4 sm:$0xff]  }
 0x246   : > { %1847 = vmatpush1.bf16.msra.mxu0 %v4020_v29  ;;  %3578 = vmatprep.subr.msk.bf16.mxu1 %vm1462_vm6, %v3577_v49  ;;  %v4077_v29 = vld [vmem:[%s5396_s4 + $0x320] ss:$8 sps:$4 sm:$0xff]  }
 0x247   : > { %1848 = vmatprep.subr.bf16.mxu0 %v4026_v35 }
 0x249   : > { %2077 = vmatpush2.bf16.msra.mxu1 %v2045_v11 }
 0x24a   : > { %1849 = vmatpush1.bf16.msra.mxu0 %v4024_v42  ;;  %2078 = vmatprep.subr.bf16.mxu1 %v4030_v34  ;;  %v4083_v42 = vld [vmem:[%s5399_s7 + $0x30] sm:$0xff]  }
 0x24b   : > { %1850 = vmatprep.subr.bf16.mxu0 %v4033_v62  ;;  %v4087_v62 = vld [vmem:[%s5399_s7 + $0x20] sm:$0xff]  }
 0x24d   : > { %2079 = vmatpush2.bf16.msra.mxu1 %v4028_v9 }
 0x24e   : > { %1851 = vmatpush1.bf16.msra.mxu0 %v4031_v27  ;;  %2080 = vmatprep.subr.bf16.mxu1 %v4036_v40 }
 0x24f   : > { %1852 = vmatprep.subr.bf16.mxu0 %v4039_v15 }
 0x251   : > { %2081 = vmatpush2.bf16.msra.mxu1 %v4034_v38 }
 0x252   : > { %1853 = vmatpush1.bf16.msra.mxu0 %v4037_v31 }
 0x253   : > { %3532 = vmatprep.subr.msk.bf16.mxu0 %vm1462_vm6, %v3531_v44 }
 0x254   : > { %2083 = vmatmul.mubr.bf16.vlgmr.msra.gmra.mxu1 %v1923_v48 }
 0x255   : > { %3580 = vmatprep.mubr.msk.bf16.mxu1 %vm1455_vm7, %v4839_v19  ;;  %v1713_v19 = vrot.slane %v4792_v58, 1  ;;  %v4051_v58 = vld [vmem:[%s5396_s4 + $0x300] ss:$8 sps:$4 sm:$0xff]  }
 0x256   : > { %1865 = vmatpush2.bf16.msra.mxu0 %v1833_v55 }
 0x257   : > { %1866 = vmatprep.subr.bf16.mxu0 %v4044_v25  ;;  %v1715_v1 = vsel %vm720_vm4, %v1713_v19, %v1714_v18 }
 0x25a   : > { %1867 = vmatpush2.bf16.msra.mxu0 %v4042_v60  ;;  %v4095_v60 = vld [vmem:[%s5399_s7] sm:$0xff]  }
 0x25b   : > { %1868 = vmatprep.subr.bf16.mxu0 %v4047_v2 }
 0x25c   : > { %2093 = vmatmul.mubr.bf16.gmra.mxu1 %v1922_v50 }
 0x25d   : > { %2388 = vmatprep.mubr.bf16.mxu1 %v5423_v45 }
 0x25e   : > { %1869 = vmatpush2.bf16.msra.mxu0 %v4045_v32  ;;  %v4097_v32 = vld [vmem:[%s5399_s7 + $0x48] sm:$0xff]  }
 0x25f   : > { %2254 = vmatprep.subr.bf16.mxu0 %v4050_v14 }
 0x261   : > { %1871 = vmatmul.mubr.bf16.vlgmr.msra.gmra.mxu0 %v1715_v1 }
 0x262   : > { %3534 = vmatprep.mubr.msk.bf16.mxu0 %vm1455_vm7, %v1717_v8  ;;  %2255 = vmatpush1.bf16.msra.mxu0 %v4048_v51  ;;  %v4065_v8 = vld [vmem:[%s5396_s4 + $0x2c4] ss:$8 sps:$4 sm:$0xff]  }
 0x263   : > { %2256 = vmatprep.subr.bf16.mxu0 %v4053_v41 }
 0x266   : > { %2257 = vmatpush1.bf16.msra.mxu0 %v4051_v58 }
 0x267   : > { %2258 = vmatprep.subr.bf16.mxu0 %v4056_v4 }
 0x269   : > { %1881 = vmatmul.mubr.bf16.gmra.mxu0 %v1714_v18 }
 0x26a   : > { %2259 = vmatpush1.bf16.msra.mxu0 %v4054_v52  ;;  %3625 = vmatprep.mubr.msk.bf16.mxu0 %vm1455_vm7, %v2134_v39 }
 0x26b   : > { %2260 = vmatprep.subr.bf16.mxu0 %v4059_v21 }
 0x26e   : > { %2261 = vmatpush1.bf16.msra.mxu0 %v4057_v63 }
 0x26f   : > { %2262 = vmatprep.subr.bf16.mxu0 %v4062_v61 }
 0x272   : > { %2263 = vmatpush1.bf16.msra.mxu0 %v4060_v26 }
 0x273   : > { %2264 = vmatprep.subr.bf16.mxu0 %v4065_v8 }
 0x276   : > { %2265 = vmatpush1.bf16.msra.mxu0 %v4063_v13 }
 0x277   : > { %2266 = vmatprep.subr.bf16.mxu0 %v4068_v6 }
 0x27a   : > { %2267 = vmatpush1.bf16.msra.mxu0 %v4066_v43 }
 0x27b   : > { %2268 = vmatprep.subr.bf16.mxu0 %v4071_v54 }
 0x27e   : > { %2269 = vmatpush1.bf16.msra.mxu0 %v4069_v22  ;;  %v2311_v22 = vld [vmem:[%s5397_s5] sm:$0x3] }
 0x27f   : > { %3624 = vmatprep.subr.msk.bf16.mxu0 %vm1462_vm6, %v3623_v24 }
 0x282   : > { %2281 = vmatpush2.bf16.msra.mxu0 %v2249_v47 }
 0x283   : > { %2282 = vmatprep.subr.bf16.mxu0 %v4076_v23  ;;  %v5424_v23 = vsub.s32 0, %v4603_v33 }
 0x286   : > { %2283 = vmatpush2.bf16.msra.mxu0 %v4074_v28  ;;  %v2316_v28 = vrot.slane %v2311_v22, %v5424_v23  ;;  %v4107_v23 = vld [vmem:[%s5399_s7 + $0x110] sm:$0xff]  }
 0x287   : > { %2284 = vmatprep.subr.bf16.mxu0 %v4079_v7 }
 0x28a   : > { %2285 = vmatpush2.bf16.msra.mxu0 %v4077_v29  ;;  %v2320_v29 = vrot.slane %v2311_v22, %v1145_v57 }
 0x28b   : > { %2614 = vmatprep.subr.bf16.mxu0 %v5423_v45 }
 0x28d   : > { %2287 = vmatmul.mubr.bf16.vlgmr.msra.gmra.mxu0 %v4847_v56 }
 0x28e   : > { %3626 = vmatprep.mubr.msk.bf16.mxu0 %vm1455_vm7, %v2133_v36  ;;  %2615 = vmatpush1.bf16.msra.mxu0 %v4081_v59 }
 0x28f   : > { %2616 = vmatprep.subr.bf16.mxu0 %v5423_v45 }
 0x292   : > { %2617 = vmatpush1.bf16.msra.mxu0 %v4083_v42 }
 0x293   : > { %2618 = vmatprep.subr.bf16.mxu0 %v5423_v45 }
 0x295   : > { %2297 = vmatmul.mubr.bf16.gmra.mxu0 %v2130_v16 }
 0x296   : > { %2619 = vmatpush1.bf16.msra.mxu0 %v4085_v12 }
 0x297   : > { %2620 = vmatprep.subr.bf16.mxu0 %v5423_v45 }
 0x29a   : > { %2621 = vmatpush1.bf16.msra.mxu0 %v4087_v62 }
 0x29b   : > { %2622 = vmatprep.subr.bf16.mxu0 %v5423_v45 }
 0x29e   : > { %2623 = vmatpush1.bf16.msra.mxu0 %v4089_v10 }
 0x29f   : > { %2624 = vmatprep.subr.bf16.mxu0 %v5423_v45 }
 0x2a2   : > { %2625 = vmatpush1.bf16.msra.mxu0 %v4091_v53 }
 0x2a3   : > { %2626 = vmatprep.subr.bf16.mxu0 %v5423_v45 }
 0x2a6   : > { %2627 = vmatpush1.bf16.msra.mxu0 %v4093_v37 }
 0x2a7   : > { %2628 = vmatprep.subr.bf16.mxu0 %v5423_v45 }
 0x2aa   : > { %2629 = vmatpush1.bf16.msra.mxu0 %v4095_v60 }
 0x2ab   : > { %2642 = vmatprep.subr.bf16.mxu0 %v5423_v45 }
 0x2ae   : > { %2643 = vmatpush2.bf16.msra.mxu0 %v4097_v32 }
 0x2af   : > { %2644 = vmatprep.subr.bf16.mxu0 %v5423_v45 }
 0x2e8   : > { %v1670_v49 = vpop.f32.mrf.mxu1 }
 0x2ea   : > { %v1672_v35 = vpop.f32.mrf.mxu1 }
 0x2ec   : > { %v1674_v11 = vpop.f32.mrf.mxu1 }
 0x2ee   : > { %v1676_v56 = vpop.f32.mrf.mxu1 }
 0x2f0   : > { %v1680_v16 = vpop.f32.mrf.mxu1 }
 0x2f2   : > { %v1682_v34 = vpop.f32.mrf.mxu1 }
 0x2f4   : > { %v1684_v9 = vpop.f32.mrf.mxu1 }
 0x2f5   : > { %v1503_v27 = vpop.f32.mrf.mxu0 }
 0x2f6   : > { %v1671_v40 = vadd.f32 %v1670_v49, %v1503_v27  ;;  %v1685_v46 = vpop.f32.mrf.mxu1 }
 0x2f7   : > { %v1505_v15 = vpop.f32.mrf.mxu0 }
 0x2f8   : > { %v1673_v17 = vadd.f32 %v1672_v35, %v1505_v15 }
 0x2f9   : > { %v1507_v38 = vpop.f32.mrf.mxu0 }
 0x2fa   : > { %v1675_v0 = vadd.f32 %v1674_v11, %v1507_v38 }
 0x2fb   : > { %v1509_v31 = vpop.f32.mrf.mxu0 }
 0x2fc   : > { %v1677_v50 = vadd.f32 %v1676_v56, %v1509_v31 }
 0x2fd   : > { %v1513_v44 = vpop.f32.mrf.mxu0 }
 0x2fe   : > { %v1681_v3 = vadd.f32 %v1680_v16, %v1513_v44 }
 0x2ff   : > { %v1515_v48 = vpop.f32.mrf.mxu0 }
 0x300   : > { %v1683_v55 = vadd.f32 %v1682_v34, %v1515_v48 }
 0x301   : > { %v1517_v25 = vpop.f32.mrf.mxu0 }
 0x303   : > { %v1518_v2 = vpop.f32.mrf.mxu0 }
 0x314   : > { %v2084_v14 = vpop.f32.mrf.mxu1 }
 0x316   : > { %v2086_v18 = vpop.f32.mrf.mxu1 }
 0x318   : > { %v2088_v19 = vpop.f32.mrf.mxu1 }
 0x31a   : > { %v2090_v51 = vpop.f32.mrf.mxu1 }
 0x31c   : > { %v2094_v41 = vpop.f32.mrf.mxu1 }
 0x31e   : > { %v2096_v1 = vpop.f32.mrf.mxu1 }
 0x320   : > { %v2098_v58 = vpop.f32.mrf.mxu1 }
 0x321   : > { %v1872_v4 = vpop.f32.mrf.mxu0  ;;  %v4092_v58 = vld [vmem:[%s5399_s7 + $0x60] sm:$0xff]  }
 0x322   : > { %v1889_v36 = vadd.f32 %v1872_v4, %v1671_v40  ;;  %v2099_v52 = vpop.f32.mrf.mxu1  ;;  %v4094_v4 = vld [vmem:[%s5399_s7 + $0x58] sm:$0xff]  }
 0x323   : > { %v1874_v20 = vpop.f32.mrf.mxu0  ;;  %v4098_v52 = vld [vmem:[%s5399_s7 + $0x98] sm:$0xff]  }
 0x324   : > { %v1890_v21 = vadd.f32 %v1874_v20, %v1673_v17  ;;  %v2101_v39 = vadd.f32 %v2084_v14, %v1889_v36  ;;  %v4080_v14 = vld [vmem:[%s5398_s6] sm:$0x1f]   ;;  %v4096_v36 = vld [vmem:[%s5399_s7 + $0x50] sm:$0xff]  }
 0x325   : > { %v1876_v63 = vpop.f32.mrf.mxu0  ;;  %v4099_v20 = vld [vmem:[%s5399_s7 + $0x40] sm:$0xff]  }
 0x326   : > { %v1891_v61 = vadd.f32 %v1876_v63, %v1675_v0  ;;  %v2102_v26 = vadd.f32 %v2086_v18, %v1890_v21  ;;  %v4082_v18 = vld [vmem:[%s5399_s7 + $0x88] sm:$0xff]   ;;  %v4100_v21 = vld [vmem:[%s5399_s7 + $0x90] sm:$0xff]   ;;  %2645 = vmatpush2.bf16.msra.mxu0 %v4099_v20 }
 0x327   : > { %v1878_v8 = vpop.f32.mrf.mxu0  ;;  %2869 = vmatprep.subr.bf16.mxu0 %v5423_v45 }
 0x328   : > { %v2103_v13 = vadd.f32 %v2088_v19, %v1891_v61  ;;  %v1892_v30 = vadd.f32 %v1878_v8, %v1677_v50  ;;  %v4084_v19 = vld [vmem:[%s5399_s7 + $0x80] sm:$0xff]   ;;  %v4101_v8 = vld [vmem:[%s5399_s7 + $0x128] sm:$0xff]  }
 0x329   : > { %v1882_v6 = vpop.f32.mrf.mxu0 }
 0x32a   : > { %v1893_v49 = vadd.f32 %v1882_v6, %v1681_v3  ;;  %v2104_v12 = vadd.f32 %v2090_v51, %v1892_v30  ;;  %v4086_v51 = vld [vmem:[%s5399_s7 + $0x78] sm:$0xff]  }
 0x32b   : > { %v1884_v43 = vpop.f32.mrf.mxu0  ;;  %v4102_v6 = vld [vmem:[%s5399_s7 + $0xd8] sm:$0xff]  }
 0x32c   : > { %v1894_v35 = vadd.f32 %v1884_v43, %v1683_v55  ;;  %v2105_v27 = vadd.f32 %v2094_v41, %v1893_v49  ;;  %v4088_v41 = vld [vmem:[%s5399_s7 + $0x70] sm:$0xff]   ;;  %v4105_v30 = vld [vmem:[%s5399_s7 + $0x118] sm:$0xff]   ;;  %v4111_v49 = vld [vmem:[%s5399_s7 + $0x100] sm:$0xff]  }
 0x32d   : > { %v1886_v54 = vpop.f32.mrf.mxu0 }
 0x32e   : > { %v2106_v46 = vadd.f32 %v2096_v1, %v1894_v35  ;;  %v4090_v1 = vld [vmem:[%s5399_s7 + $0x68] sm:$0xff]   ;;  %v4113_v35 = vld [vmem:[%s5399_s7 + $0xf8] sm:$0xff]  }
 0x32f   : > { %v1887_v5 = vpop.f32.mrf.mxu0 }
 0x330   : > { %v4103_v5 = vld [vmem:[%s5399_s7 + $0x120] sm:$0xff]  }
 0x34d   : > { %v2288_v24 = vpop.f32.mrf.mxu0 }
 0x34e   : > { %v2305_v47 = vadd.f32 %v2288_v24, %v2101_v39  ;;  %v4104_v24 = vld [vmem:[%s5399_s7 + $0xd0] sm:$0xff]  }
 0x34f   : > { %v2290_v7 = vpop.f32.mrf.mxu0 }
 0x350   : > { %v2306_v59 = vadd.f32 %v2290_v7, %v2102_v26  ;;  %v2323_v11 = vadd.f32 %v2316_v28, %v2305_v47  ;;  %v4106_v47 = vld [vmem:[%s5399_s7 + $0xc8] sm:$0xff]  }
 0x351   : > { %v2292_v42 = vpop.f32.mrf.mxu0  ;;  %v4109_v7 = vld [vmem:[%s5399_s7 + $0x108] sm:$0xff]  }
 0x352   : > { %v2307_v56 = vadd.f32 %v2292_v42, %v2103_v13  ;;  %v2324_v16 = vadd.f32 %v2320_v29, %v2306_v59  ;;  %v2329_v10 = vmax.f32 %v2323_v11, 0.0  ;;  %v4112_v59 = vld [vmem:[%s5399_s7 + $0xb0] sm:$0xff]   ;;  %v4114_v42 = vld [vmem:[%s5399_s7 + $0xa8] sm:$0xff]  }
 0x353   : > { %v2294_v34 = vpop.f32.mrf.mxu0  ;;  %v4115_v11 = vld [vmem:[%s5399_s7 + $0xf0] sm:$0xff]  }
 0x354   : > { %v2325_v62 = vadd.f32 %v2316_v28, %v2307_v56  ;;  %v2308_v9 = vadd.f32 %v2294_v34, %v2104_v12  ;;  %v2330_v33 = vmax.f32 %v2324_v16, 0.0  ;;  %v4116_v56 = vld [vmem:[%s5399_s7 + $0xa0] sm:$0xff]   ;;  %v4117_v12 = vld [vmem:[%s5399_s7 + $0x138] sm:$0xff]   ;;  %v4118_v16 = vld [vmem:[%s5399_s7 + $0xe8] sm:$0xff]  }
 0x355   : > { %v2298_v40 = vpop.f32.mrf.mxu0  ;;  %v4119_v34 = vld [vmem:[%s5399_s7 + $0x130] sm:$0xff]  }
 0x356   : > { %v2331_v15 = vmax.f32 %v2325_v62, 0.0  ;;  %v2326_v17 = vadd.f32 %v2320_v29, %v2308_v9  ;;  %v2309_v38 = vadd.f32 %v2298_v40, %v2105_v27  ;;  %v4120_v9 = vld [vmem:[%s5399_s7 + $0xe0] sm:$0xff]  }
 0x357   : > { %v2300_v57 = vpop.f32.mrf.mxu0 }
 0x358   : > { %v2337_v0 = vpack.c.bf16 %v2331_v15, %v2329_v10  ;;  %v2332_v53 = vmax.f32 %v2326_v17, 0.0  ;;  %v2327_v31 = vadd.f32 %v2316_v28, %v2309_v38  ;;  %v2310_v50 = vadd.f32 %v2300_v57, %v2106_v46  ;;  %v4108_v28 = vld [vmem:[%s5399_s7 + $0xc0] sm:$0xff]   ;;  %v4121_v46 = vld [vmem:[%s5399_s7 + $0x178] sm:$0xff]   ;;  %v4122_v17 = vld [vmem:[%s5399_s7 + $0x170] sm:$0xff]  }
 0x359   : > { %v2302_v44 = vpop.f32.mrf.mxu0  ;;  %v4123_v38 = vld [vmem:[%s5399_s7 + $0x168] sm:$0xff]   ;;  %v4125_v57 = vld [vmem:[%s5399_s7 + $0x158] sm:$0xff]  }
 0x35a   : > { %v2333_v3 = vmax.f32 %v2327_v31, 0.0  ;;  %v2328_v37 = vadd.f32 %v2320_v29, %v2310_v50  ;;  %v2338_v48 = vpack.c.bf16 %v2332_v53, %v2330_v33  ;;  %v4110_v29 = vld [vmem:[%s5399_s7 + $0xb8] sm:$0xff]   ;;  %v4124_v33 = vld [vmem:[%s5399_s7 + $0x160] sm:$0xff]   ;;  %v4127_v53 = vld [vmem:[%s5399_s7 + $0x148] sm:$0xff]  }
 0x35b   : > { %v2303_v55 = vpop.f32.mrf.mxu0  ;;  %v4128_v31 = vld [vmem:[%s5399_s7 + $0x140] sm:$0xff]   ;;  %v4129_v50 = vld [vmem:[%s5399_s7 + $0x188] sm:$0xff]  }
 0x35c   : > { %v2339_v25 = vpack.c.bf16 %v2333_v3, %v2333_v3  ;;  %v2334_v60 = vmax.f32 %v2328_v37, 0.0  ;;  %v4130_v44 = vld [vmem:[%s5399_s7 + $0x180] sm:$0xff]   ;;  %v4131_v37 = vld [vmem:[%s5401_s9 + $0x38] sm:$0xff]   ;;  %v4132_v55 = vld [vmem:[%s5401_s9 + $0x30] sm:$0xff]  }
 0x35e   : > { %v2340_v2 = vpack.c.bf16 %v2334_v60, %v2334_v60  ;;  %v2351_v32 = vsel %vm1462_vm6, %v2339_v25, 0  ;;  %v4134_v25 = vld [vmem:[%s5401_s9 + $0x20] sm:$0xff]   ;;  %v4135_v60 = vld [vmem:[%s5401_s9 + $0x18] sm:$0xff]  }
 0x360   : > { %3628 = vmatprep.subr.msk.bf16.mxu1 %vm1462_vm6, %v2340_v2  ;;  %v4136_v2 = vld [vmem:[%s5401_s9 + $0x10] sm:$0xff]  }
 0x361   : > { %2369 = vmatpush1.bf16.msra.mxu1 %v2351_v32  ;;  %v4137_v32 = vld [vmem:[%s5401_s9 + $0x8] sm:$0xff]  }
 0x362   : > { %2370 = vmatprep.subr.bf16.mxu1 %v2338_v48  ;;  %v4210_v48 = vmov 0.0  }
 0x365   : > { %2371 = vmatpush1.bf16.msra.mxu1 %v2337_v0  ;;  %v4126_v0 = vld [vmem:[%s5399_s7 + $0x150] sm:$0xff]  }
 0x366   : > { %2511 = vmatprep.subr.bf16.mxu1 %v5423_v45 }
 0x368   : > { %3629 = vmatmul.mubr.msk.bf16.vlgmr.msra.gmra.mxu1 %vm2346_vm8, %v4080_v14  ;;  %v4138_v14 = vld [vmem:[%s5401_s9] sm:$0xff]  }
 0x369   : > { %2512 = vmatpush1.bf16.msra.mxu1 %v4082_v18  ;;  %v4139_v18 = vld [vmem:[%s5403_s11 + $0x38] sm:$0xff]  }
 0x36a   : > { %2513 = vmatprep.subr.bf16.mxu1 %v5423_v45 }
 0x36d   : > { %2514 = vmatpush1.bf16.msra.mxu1 %v4084_v19  ;;  %v4140_v19 = vld [vmem:[%s5403_s11 + $0x30] sm:$0xff]  }
 0x36e   : > { %2515 = vmatprep.subr.bf16.mxu1 %v5423_v45 }
 0x371   : > { %2516 = vmatpush1.bf16.msra.mxu1 %v4086_v51  ;;  %v4141_v51 = vld [vmem:[%s5403_s11 + $0x28] sm:$0xff]  }
 0x372   : > { %2517 = vmatprep.subr.bf16.mxu1 %v5423_v45 }
 0x375   : > { %2518 = vmatpush1.bf16.msra.mxu1 %v4088_v41  ;;  %v4142_v41 = vld [vmem:[%s5403_s11 + $0x20] sm:$0xff]  }
 0x376   : > { %2519 = vmatprep.subr.bf16.mxu1 %v5423_v45 }
 0x379   : > { %2520 = vmatpush1.bf16.msra.mxu1 %v4090_v1  ;;  %v4143_v1 = vld [vmem:[%s5403_s11 + $0x18] sm:$0xff]  }
 0x37a   : > { %2521 = vmatprep.subr.bf16.mxu1 %v5423_v45 }
 0x37d   : > { %2522 = vmatpush1.bf16.msra.mxu1 %v4092_v58  ;;  %v4144_v58 = vld [vmem:[%s5403_s11 + $0x10] sm:$0xff]  }
 0x37e   : > { %2523 = vmatprep.subr.bf16.mxu1 %v5423_v45 }
 0x381   : > { %2524 = vmatpush1.bf16.msra.mxu1 %v4094_v4 }
 0x382   : > { %2525 = vmatprep.subr.bf16.mxu1 %v5423_v45 }
 0x385   : > { %2526 = vmatpush1.bf16.msra.mxu1 %v4096_v36 }
 0x386   : > { %2539 = vmatprep.subr.bf16.mxu1 %v5423_v45 }
 0x389   : > { %2540 = vmatpush2.bf16.msra.mxu1 %v4098_v52 }
 0x38a   : > { %2541 = vmatprep.subr.bf16.mxu1 %v5423_v45 }
 0x38d   : > { %2542 = vmatpush2.bf16.msra.mxu1 %v4100_v21 }
 0x38e   : > { %2741 = vmatprep.subr.bf16.mxu1 %v5423_v45 }
 0x428   : > { %v2390_v39 = vpop.f32.mrf.mxu1 }
 0x429   : > { %v5142_v63 = vpack.c.bf16 %v2390_v39, %v2390_v39 }
 0x42a   : > { %v2392_v61 = vpop.f32.mrf.mxu1 }
 0x42b   : > { %v2400_v26 = vpack.c.bf16 %v2392_v61, %v2392_v61  ;;  %v2444_v43 = vrot.slane %v5142_v63, 1  ;;  %v2803_v40 = vrot.slane %v5142_v63, 3  ;;  %v2675_v10 = vrot.slane %v5142_v63, 2 }
 0x42c   : > { %v2394_v62 = vpop.f32.mrf.mxu1 }
 0x42d   : > { %3671 = vmatprep.mubr.msk.bf16.mxu0 %vm2507_vm9, %v2400_v26  ;;  %v2445_v13 = vrot.slane %v2400_v26, 1  ;;  %v2804_v54 = vrot.slane %v2400_v26, 3  ;;  %v2676_v22 = vrot.slane %v2400_v26, 2  ;;  %v2910_v3 = vpack.c.bf16 %v2394_v62, %v2394_v62 }
 0x42e   : > { %2647 = vmatmul.mubr.bf16.vlgmr.msra.gmra.mxu0 %v5142_v63  ;;  %v2396_v27 = vpop.f32.mrf.mxu1 }
 0x42f   : > { %2870 = vmatpush1.bf16.msra.mxu0 %v4101_v8  ;;  %3660 = vmatprep.mubr.msk.bf16.mxu1 %vm2507_vm9, %v2445_v13  ;;  %v2911_v15 = vpack.c.bf16 %v2396_v27, %v2396_v27 }
 0x430   : > { %2544 = vmatmul.mubr.bf16.vlgmr.msra.gmra.mxu1 %v2444_v43  ;;  %2871 = vmatprep.subr.bf16.mxu0 %v5423_v45 }
 0x431   : > { %2742 = vmatpush1.bf16.msra.mxu1 %v4102_v6  ;;  %3702 = vmatprep.mubr.msk.bf16.mxu1 %vm2507_vm9, %v2676_v22 }
 0x432   : > { %2743 = vmatprep.subr.bf16.mxu1 %v5423_v45  ;;  %3733 = vmatprep.mubr.msk.bf16.mxu0 %vm2507_vm9, %v2804_v54 }
 0x433   : > { %2872 = vmatpush1.bf16.msra.mxu0 %v4103_v5 }
 0x434   : > { %2873 = vmatprep.subr.bf16.mxu0 %v5423_v45 }
 0x435   : > { %2744 = vmatpush1.bf16.msra.mxu1 %v4104_v24 }
 0x436   : > { %2745 = vmatprep.subr.bf16.mxu1 %v5423_v45 }
 0x437   : > { %2874 = vmatpush1.bf16.msra.mxu0 %v4105_v30 }
 0x438   : > { %2875 = vmatprep.subr.bf16.mxu0 %v5423_v45 }
 0x439   : > { %2746 = vmatpush1.bf16.msra.mxu1 %v4106_v47 }
 0x43a   : > { %2747 = vmatprep.subr.bf16.mxu1 %v5423_v45 }
 0x43b   : > { %2876 = vmatpush1.bf16.msra.mxu0 %v4107_v23 }
 0x43c   : > { %2877 = vmatprep.subr.bf16.mxu0 %v5423_v45 }
 0x43d   : > { %2748 = vmatpush1.bf16.msra.mxu1 %v4108_v28  ;;  %v3765_v28 = vld [vmem:[%s5400_s8] ss:$0 sm:$0xff] }
 0x43e   : > { %2749 = vmatprep.subr.bf16.mxu1 %v5423_v45 }
 0x43f   : > { %2878 = vmatpush1.bf16.msra.mxu0 %v4109_v7 }
 0x440   : > { %2879 = vmatprep.subr.bf16.mxu0 %v5423_v45 }
 0x441   : > { %2750 = vmatpush1.bf16.msra.mxu1 %v4110_v29 }
 0x442   : > { %2751 = vmatprep.subr.bf16.mxu1 %v5423_v45 }
 0x443   : > { %2880 = vmatpush1.bf16.msra.mxu0 %v4111_v49 }
 0x444   : > { %2881 = vmatprep.subr.bf16.mxu0 %v5423_v45 }
 0x445   : > { %2752 = vmatpush1.bf16.msra.mxu1 %v4112_v59 }
 0x446   : > { %2753 = vmatprep.subr.bf16.mxu1 %v5423_v45 }
 0x447   : > { %2882 = vmatpush1.bf16.msra.mxu0 %v4113_v35 }
 0x448   : > { %2883 = vmatprep.subr.bf16.mxu0 %v5423_v45 }
 0x449   : > { %2754 = vmatpush1.bf16.msra.mxu1 %v4114_v42 }
 0x44a   : > { %2755 = vmatprep.subr.bf16.mxu1 %v5423_v45 }
 0x44b   : > { %2884 = vmatpush1.bf16.msra.mxu0 %v4115_v11 }
 0x44c   : > { %2897 = vmatprep.subr.bf16.mxu0 %v5423_v45 }
 0x44d   : > { %2756 = vmatpush1.bf16.msra.mxu1 %v4116_v56  ;;  %v4145_v56 = vld [vmem:[%s5403_s11 + $0x8] sm:$0xff]  }
 0x44e   : > { %2769 = vmatprep.subr.bf16.mxu1 %v5423_v45 }
 0x44f   : > { %2898 = vmatpush2.bf16.msra.mxu0 %v4117_v12  ;;  %v4146_v12 = vld [vmem:[%s5403_s11] sm:$0xff]  }
 0x450   : > { %2899 = vmatprep.subr.bf16.mxu0 %v5423_v45 }
 0x451   : > { %2770 = vmatpush2.bf16.msra.mxu1 %v4118_v16  ;;  %v3766_v16 = vld [vmem:[%s5402_s10] ss:$0 sm:$0xff] }
 0x452   : > { %2771 = vmatprep.subr.bf16.mxu1 %v5423_v45 }
 0x453   : > { %2900 = vmatpush2.bf16.msra.mxu0 %v4119_v34 }
 0x454   : > { %3806 = vmatprep.subr.bf16.mxu0 %v4210_v48 }
 0x455   : > { %2772 = vmatpush2.bf16.msra.mxu1 %v4120_v9 }
 0x456   : > { %2902 = vmatmul.mubr.bf16.vlgmr.msra.gmra.mxu0 %v2803_v40  ;;  %2996 = vmatprep.subr.bf16.mxu1 %v5423_v45 }
 0x457   : > { %3807 = vmatpush3.bf16.msra.mxu0 %v4131_v37  ;;  %3822 = vmatprep.mubr.msk.bf16.mxu0 %vm4211_vm10, %v4210_v48 }
 0x458   : > { %2774 = vmatmul.mubr.bf16.vlgmr.msra.gmra.mxu1 %v2675_v10  ;;  %3808 = vmatprep.subr.bf16.mxu0 %v4210_v48 }
 0x459   : > { %2997 = vmatpush1.bf16.msra.mxu1 %v4121_v46  ;;  %3764 = vmatprep.mubr.msk.bf16.mxu1 %vm2507_vm9, %v2911_v15  ;;  %v3775_v15 = vld [vmem:[%s5404_s12] ss:$0 sm:$0xff] }
 0x45a   : > { %2998 = vmatprep.subr.bf16.mxu1 %v5423_v45 }
 0x45b   : > { %3809 = vmatpush3.bf16.msra.mxu0 %v4132_v55 }
 0x45c   : > { %3810 = vmatprep.subr.bf16.mxu0 %v4210_v48 }
 0x45d   : > { %2999 = vmatpush1.bf16.msra.mxu1 %v4122_v17 }
 0x45e   : > { %3000 = vmatprep.subr.bf16.mxu1 %v5423_v45 }
 0x461   : > { %3001 = vmatpush1.bf16.msra.mxu1 %v4123_v38 }
 0x462   : > { %3002 = vmatprep.subr.bf16.mxu1 %v5423_v45 }
 0x465   : > { %3003 = vmatpush1.bf16.msra.mxu1 %v4124_v33 }
 0x466   : > { %3004 = vmatprep.subr.bf16.mxu1 %v5423_v45 }
 0x469   : > { %3005 = vmatpush1.bf16.msra.mxu1 %v4125_v57 }
 0x46a   : > { %3006 = vmatprep.subr.bf16.mxu1 %v5423_v45 }
 0x46d   : > { %3007 = vmatpush1.bf16.msra.mxu1 %v4126_v0 }
 0x46e   : > { %3008 = vmatprep.subr.bf16.mxu1 %v5423_v45 }
 0x471   : > { %3009 = vmatpush1.bf16.msra.mxu1 %v4127_v53 }
 0x472   : > { %3010 = vmatprep.subr.bf16.mxu1 %v5423_v45 }
 0x475   : > { %3011 = vmatpush1.bf16.msra.mxu1 %v4128_v31 }
 0x476   : > { %3024 = vmatprep.subr.bf16.mxu1 %v5423_v45 }
 0x479   : > { %3025 = vmatpush2.bf16.msra.mxu1 %v4129_v50 }
 0x47a   : > { %3026 = vmatprep.subr.bf16.mxu1 %v5423_v45  ;;  %v4133_v45 = vld [vmem:[%s5401_s9 + $0x28] sm:$0xff]  }
 0x47b   : > { %3811 = vmatpush3.bf16.msra.mxu0 %v4133_v45 }
 0x47c   : > { %3812 = vmatprep.subr.bf16.mxu0 %v4210_v48 }
 0x47d   : > { %3027 = vmatpush2.bf16.msra.mxu1 %v4130_v44 }
 0x47e   : > { %3826 = vmatprep.subr.bf16.mxu1 %v4210_v48 }
 0x47f   : > { %3813 = vmatpush3.bf16.msra.mxu0 %v4134_v25 }
 0x480   : > { %3029 = vmatmul.mubr.bf16.vlgmr.msra.gmra.mxu1 %v2910_v3  ;;  %3814 = vmatprep.subr.bf16.mxu0 %v4210_v48 }
 0x481   : > { %3842 = vmatprep.mubr.msk.bf16.mxu1 %vm4211_vm10, %v4210_v48  ;;  %3827 = vmatpush3.bf16.msra.mxu1 %v4139_v18 }
 0x482   : > { %3828 = vmatprep.subr.bf16.mxu1 %v4210_v48 }
 0x483   : > { %3815 = vmatpush3.bf16.msra.mxu0 %v4135_v60 }
 0x484   : > { %3816 = vmatprep.subr.bf16.mxu0 %v4210_v48 }
 0x485   : > { %3829 = vmatpush3.bf16.msra.mxu1 %v4140_v19 }
 0x486   : > { %3830 = vmatprep.subr.bf16.mxu1 %v4210_v48 }
 0x487   : > { %3817 = vmatpush3.bf16.msra.mxu0 %v4136_v2 }
 0x488   : > { %3818 = vmatprep.subr.bf16.mxu0 %v4210_v48 }
 0x489   : > { %3831 = vmatpush3.bf16.msra.mxu1 %v4141_v51 }
 0x48a   : > { %3832 = vmatprep.subr.bf16.mxu1 %v4210_v48 }
 0x48b   : > { %3819 = vmatpush3.bf16.msra.mxu0 %v4137_v32 }
 0x48c   : > { %3820 = vmatprep.subr.bf16.mxu0 %v4210_v48 }
 0x48d   : > { %3833 = vmatpush3.bf16.msra.mxu1 %v4142_v41 }
 0x48e   : > { %3834 = vmatprep.subr.bf16.mxu1 %v4210_v48 }
 0x48f   : > { %3821 = vmatpush3.bf16.msra.mxu0 %v4138_v14 }
 0x491   : > { %3835 = vmatpush3.bf16.msra.mxu1 %v4143_v1 }
 0x492   : > { %3836 = vmatprep.subr.bf16.mxu1 %v4210_v48 }
 0x495   : > { %3837 = vmatpush3.bf16.msra.mxu1 %v4144_v58 }
 0x496   : > { %3838 = vmatprep.subr.bf16.mxu1 %v4210_v48 }
 0x499   : > { %3839 = vmatpush3.bf16.msra.mxu1 %v4145_v56 }
 0x49a   : > { %3840 = vmatprep.subr.bf16.mxu1 %v4210_v48 }
 0x49d   : > { %3841 = vmatpush3.bf16.msra.mxu1 %v4146_v12 }
 0x4ee   : > { %v2648_v4 = vpop.f32.mrf.mxu0 }
 0x4f0   : > { %v2545_v36 = vpop.f32.mrf.mxu1  ;;  %v2650_v52 = vpop.f32.mrf.mxu0 }
 0x4f1   : > { %v2649_v20 = vadd.f32 %v2648_v4, %v2545_v36 }
 0x4f2   : > { %v2547_v21 = vpop.f32.mrf.mxu1  ;;  %v2651_v39 = vpop.f32.mrf.mxu0 }
 0x4f4   : > { %v2548_v63 = vpop.f32.mrf.mxu1  ;;  %v2652_v61 = vpop.f32.mrf.mxu0 }
 0x4f6   : > { %v2549_v26 = vpop.f32.mrf.mxu1 }
 0x516   : > { %v2903_v8 = vpop.f32.mrf.mxu0 }
 0x518   : > { %v2775_v13 = vpop.f32.mrf.mxu1  ;;  %v2905_v6 = vpop.f32.mrf.mxu0 }
 0x519   : > { %v2781_v30 = vadd.f32 %v2775_v13, %v2649_v20 }
 0x51a   : > { %v2777_v43 = vpop.f32.mrf.mxu1  ;;  %v2906_v54 = vpop.f32.mrf.mxu0 }
 0x51b   : > { %v2909_v47 = vadd.f32 %v2903_v8, %v2781_v30 }
 0x51c   : > { %v2778_v5 = vpop.f32.mrf.mxu1  ;;  %v2907_v22 = vpop.f32.mrf.mxu0 }
 0x51e   : > { %v2779_v24 = vpop.f32.mrf.mxu1 }
 0x540   : > { %v3030_v23 = vpop.f32.mrf.mxu1 }
 0x541   : > { %v3036_v7 = vadd.f32 %v3030_v23, %v2909_v47 }
 0x542   : > { %v3032_v29 = vpop.f32.mrf.mxu1 }
 0x543   : > { %v3044_v49 = vadd.f32 %v3765_v28, %v3036_v7 }
 0x544   : > { %v3033_v59 = vpop.f32.mrf.mxu1 }
 0x545   : > { %v3045_v35 = vmax.f32 %v3044_v49, 0.0 }
 0x546   : > { %v3034_v42 = vpop.f32.mrf.mxu1 }
 0x547   : > { %v3046_v11 = vpack.c.bf16 %v3045_v35, %v3045_v35 }
 0x549   : > { %3823 = vmatmul.mubr.bf16.vlgmr.msra.gmra.mxu0 %v3046_v11 }
 0x609   : > { %v3152_v34 = vpop.f32.mrf.mxu0 }
 0x60a   : > { %v3153_v62 = vadd.f32 %v3766_v16, %v3152_v34 }
 0x60b   : > { %v3824_v9 = vpop.f32.mrf.mxu0 }
 0x60c   : > { %v3158_v27 = vmax.f32 %v3153_v62, 0.0 }
 0x60d   : > { %v3155_v40 = vpop.f32.mrf.mxu0 }
 0x60e   : > { %v3159_v46 = vpack.c.bf16 %v3158_v27, %v3158_v27 }
 0x60f   : > { %v3825_v10 = vpop.f32.mrf.mxu0 }
 0x610   : > { %3843 = vmatmul.mubr.bf16.vlgmr.msra.gmra.mxu1 %v3159_v46 }
 0x6d0   : > { %v3265_v17 = vpop.f32.mrf.mxu1 }
 0x6d1   : > { %v3266_v38 = vadd.f32 %v3775_v15, %v3265_v17 }
 0x6d2   : > { %v3844_v33 = vpop.f32.mrf.mxu1 }
 0x6d3   : > { %3271 = vst [vmem:[%s434_s23] sm:$0x3] %v3266_v38 }
 0x6d4   : > { %v3268_v57 = vpop.f32.mrf.mxu1 }
 0x6d5   : > { %4160 = shalt.err (!%p4157_p3)
}
 0x6d6   : > { %s4161_s22 = scalar_lea.hbm %s5351_s16, 32  ;;  %s4165_s15 = scalar_lea.hbm %s5405_s13, 64 }
 0x6d7   : > { %p4162_p4 = scmp.ne.s32.totalorder %s5351_s16, %s4161_s22  ;;  %p4166_p9 = scmp.lt.s32.totalorder %s5351_s16, %s5405_s13 }
 0x6d8   : > { %p4167_p10 = scmp.lt.s32.totalorder %s4165_s15, %s4161_s22 }
 0x6d9   : > { %p4163_p7 = pnand %p4162_p4, %p4321_p5 }
 0x6da   : > { %p4168_p11 = por %p4167_p10, %p4166_p9 }
 0x6db   : > { %p4164_p8 = pneg %p4163_p7 }
 0x6dd   : > { %p4169_p12 = pnand %p4168_p11, %p4164_p8 }
 0x6df   : > { %4172 = shalt.err (!%p4169_p12)
}
 0x6e0   : > { %3846 = dma.vmem_to_hbm [thread:$0]  (%p4321_p5), %s5353_s30, 32, %s5351_s16, %s3273_s24   ;;  %v3845_v0 = vpop.f32.mrf.mxu1 }
 0x6e1 PF: > { %p3852_p13 = scmp.ge.s32.totalorder %s4207_s28, 2  ;;  %s3298_s20 = sand.u32 1, %s4195_s25  }
 0x6e2   : > { %s3299_s17 = scalar_lea.sflag [#allocation3], %s3298_s20 }
 0x6e3   : > { %p3849_p0 = pnand %p3852_p13, %p4325_p6 }
 0x6e5   : > { %p3850_p1 = pneg %p3849_p0 }
 0x6e7   : > { %4190 = dma.done.wait (%p3850_p1), %s3299_s17, 32  }
 0x6e8   : > { %4192 = vsyncadd (%p3850_p1), %s3299_s17, 4294967264  ;;  %s5425_s28 = sld [smem:[#allocation6_spill]]  ;;  %s5428_s25 = smov %s4199_s26 }
 0x6e9   : > { %s5426_s21 = sld [smem:[#allocation5_spill]] }
 0x6ea   : > { %s5427_s27 = sld [smem:[#allocation7_spill]] }
 0x6ee   : > { %p23_p2 = scmp.ge.s32.totalorder %s5425_s28, 4  }
 0x6ef   : > { %s5429_s26 = smov %s5426_s21 }
 0x6f0   :  { %25 = sbr.rel (!%p23_p2) target bundleno = 3 (0x3), region = 119 }
 0x6f5   :  { %3304 = vsyncpa [#allocation3], 1 }
 0x6f6   :  { %3306 = vsyncpa [#allocation3 + $0x1], 1 }

</bundles_post_ra>
